<compile_context>
chip_gen: v7x
topology: tpu7x:2x2x1
jax: 0.10.0
libtpu: 0.0.40
codegen_flags: <defaults>
</compile_context>

<pallas_src>
import math
import numpy as np
import jax
import jax.numpy as jnp
from jax.experimental import pallas as pl
from jax.experimental.pallas import tpu as pltpu

VOCAB = 64
DIM = 128              # torch default 768 -> scaled down, still divisible by 8 heads
HEADS = 8
HEAD_DIM = DIM // HEADS
LABELS = 2
BATCH = 2              # B
SEQ = 8                # S

# NOTE: nn.Dropout is identity in eval mode -> not emitted.
# NOTE: linear1..linear4 / leaky_relu are dead code in the torch forward (every `hidden`
#       assignment is overwritten; only tanh(linear5(x)) feeds fc) -> not computed.


def fused_text_mlp_kernel(tok_ref,                    # (B*S,) int32  SMEM
                          emb_ref,                    # (VOCAB, D)    VMEM
                          wqkv_ref, bqkv_ref,         # (D, 3D), (1, 3D)
                          wo_ref, bo_ref,             # (D, D), (1, D)
                          w5_ref, b5_ref,             # (D, D), (1, D)
                          wfc_ref, bfc_ref,           # (D, LABELS), (1, LABELS)
                          o_ref,                      # (B, LABELS)
                          xa_buf,                     # (B*S, D) scratch: attn-ordered emb
                          gate_buf):                  # (B*S, D) scratch: emb*attn, flat order
    B, S, D, H, HD = BATCH, SEQ, DIM, HEADS, HEAD_DIM
    R = B * S

    # ---- 1) embedding gather, written directly in attention (n, l) row order ------
    # flat (b, s) row r maps to attention batch n = r % B, position l = r // B; this IS
    # torch's `.view(S, B, D)` reinterpret, done once at gather time (no transposes).
    for r in range(R):                                  # static unroll (16 rows)
        t = tok_ref[r]
        n, l = r % B, r // B
        xa_buf[pl.ds(n * S + l, 1), :] = emb_ref[pl.ds(t, 1), :]

    # ---- 2) fused Q/K/V projection: ONE (R, D) @ (D, 3D) matmul ---------------------
    xa = xa_buf[...]                                    # (R, D)
    qkv = jnp.dot(xa, wqkv_ref[...],
                  preferred_element_type=jnp.float32) + bqkv_ref[...]     # (R, 3D)

    # ---- 3) multi-head self-attention per attention batch (N = B, static) ----------
    for n in range(B):
        qkv_n = qkv[n * S:(n + 1) * S, :]               # (L, 3D) contiguous rows
        q = qkv_n[:, :D]                                # 1/sqrt(hd) already folded in
        k = qkv_n[:, D:2 * D]
        v = qkv_n[:, 2 * D:]
        acc = jnp.zeros((S, D), jnp.float32)
        for h in range(H):                              # static unroll
            lo = h * HD
            qh = q[:, lo:lo + HD]                       # (L, hd)
            kh = k[:, lo:lo + HD]
            vh = v[:, lo:lo + HD]
            sc = jax.lax.dot_general(qh, kh, (((1,), (1,)), ((), ())),
                                     preferred_element_type=jnp.float32)  # (L, L)
            sc = sc - jnp.max(sc, axis=-1, keepdims=True)
            p = jnp.exp(sc)
            # EUP reciprocal instead of a VALU divide
            p = p * pl.reciprocal(jnp.sum(p, axis=-1, keepdims=True), approx=True)
            ctx_h = jnp.dot(p, vh, preferred_element_type=jnp.float32)    # (L, hd)
            # accumulate the output projection per head -> no (L, D) head concat
            acc = acc + jnp.dot(ctx_h, wo_ref[pl.ds(lo, HD), :],
                                preferred_element_type=jnp.float32)
        attn_n = acc + bo_ref[...]                      # (L, D)
        # gate with the matching embedding rows and scatter back to flat (b, s) order:
        # attention row (n, l) <-> flat row l*B + n  (torch's `.view(B, S, D)`).
        g_n = xa_buf[pl.ds(n * S, S), :] * attn_n       # (L, D)
        for l in range(S):                              # static unroll (8 rows)
            gate_buf[pl.ds(l * B + n, 1), :] = g_n[l:l + 1, :]

    # ---- 4) fused tail: max over seq -> tanh(linear5) -> fc -------------------------
    gate = gate_buf[...].reshape(B, S, D)               # free retile: (16,128)->(2,8,128)
    pooled = jnp.max(gate, axis=1)                      # (B, D) == torch.max(x, 1)[0]
    hdn = jnp.tanh(jnp.dot(pooled, w5_ref[...],
                           preferred_element_type=jnp.float32) + b5_ref[...])
    o_ref[...] = jnp.dot(hdn, wfc_ref[...],
                         preferred_element_type=jnp.float32) + bfc_ref[...]


def text_mlp_forward(token_ids, kp):
    B, S = token_ids.shape
    tok_flat = token_ids.reshape(-1).astype(jnp.int32)
    vmem_specs = [pl.BlockSpec(memory_space=pltpu.MemorySpace.VMEM) for _ in range(9)]
    return pl.pallas_call(
        fused_text_mlp_kernel,
        out_shape=jax.ShapeDtypeStruct((B, LABELS), jnp.float32),
        in_specs=[pl.BlockSpec(memory_space=pltpu.MemorySpace.SMEM)] + vmem_specs,
        out_specs=pl.BlockSpec(memory_space=pltpu.MemorySpace.VMEM),
        scratch_shapes=[pltpu.VMEM((B * S, DIM), jnp.float32),   # attn-ordered embeddings
                        pltpu.VMEM((B * S, DIM), jnp.float32)],  # gated rows, flat order
    )(tok_flat, kp["emb"], kp["wqkv"], kp["bqkv"], kp["wo_t"], kp["bo"],
      kp["w5_t"], kp["b5"], kp["wfc_t"], kp["bfc"])


def init_params(key):
    ks = jax.random.split(key, 7)

    def lin(k, out_dim, in_dim):
        kw, kb = jax.random.split(k)
        w = jax.random.normal(kw, (out_dim, in_dim), jnp.float32) * 0.05
        b = jax.random.normal(kb, (1, out_dim), jnp.float32) * 0.05
        return w, b

    emb = jax.random.normal(ks[0], (VOCAB, DIM), jnp.float32) * 0.1
    wq, bq = lin(ks[1], DIM, DIM)       # in_proj_weight[:D]
    wk, bk = lin(ks[2], DIM, DIM)       # in_proj_weight[D:2D]
    wv, bv = lin(ks[3], DIM, DIM)       # in_proj_weight[2D:]
    wo, bo = lin(ks[4], DIM, DIM)       # out_proj
    w5, b5 = lin(ks[5], DIM, DIM)       # linear5 (only live hidden layer)
    wfc, bfc = lin(ks[6], LABELS, DIM)  # fc
    return dict(emb=emb, wq=wq, bq=bq, wk=wk, bk=bk, wv=wv, bv=bv,
                wo=wo, bo=bo, w5=w5, b5=b5, wfc=wfc, bfc=bfc)


def prepare_kernel_params(p):
    """Kernel-side layout: (in, out) weights; fused QKV with 1/sqrt(hd) folded into Q."""
    scale = 1.0 / math.sqrt(HEAD_DIM)
    wqkv = jnp.concatenate([p["wq"].T * scale, p["wk"].T, p["wv"].T], axis=1)  # (D, 3D)
    bqkv = jnp.concatenate([p["bq"] * scale, p["bk"], p["bv"]], axis=1)        # (1, 3D)
    return dict(emb=p["emb"], wqkv=wqkv, bqkv=bqkv,
                wo_t=p["wo"].T, bo=p["bo"],
                w5_t=p["w5"].T, b5=p["b5"],
                wfc_t=p["wfc"].T, bfc=p["bfc"])


def reference_forward(token_ids, p):
    """Pure-JAX mirror of the torch forward (eval mode) for validation."""
    B, S = token_ids.shape
    D = DIM
    emb = p["emb"][token_ids]                            # (B, S, D)
    x = emb.reshape(S, B, D)                             # .view(S, B, D) reinterpret
    q = (x @ p["wq"].T + p["bq"]) / jnp.sqrt(jnp.float32(HEAD_DIM))
    k = x @ p["wk"].T + p["bk"]
    v = x @ p["wv"].T + p["bv"]

    def heads(t):                                        # (L,N,D) -> (N,H,L,hd)
        return t.reshape(S, B, HEADS, HEAD_DIM).transpose(1, 2, 0, 3)

    qh, kh, vh = heads(q), heads(k), heads(v)
    s = jnp.einsum("nhld,nhmd->nhlm", qh, kh)
    pr = jax.nn.softmax(s, axis=-1)
    ctx = jnp.einsum("nhlm,nhmd->nhld", pr, vh)          # (N,H,L,hd)
    ctx = ctx.transpose(2, 0, 1, 3).reshape(S, B, D)     # (L,N,D)
    attn_out = ctx @ p["wo"].T + p["bo"]
    attn_bsd = attn_out.reshape(B, S, D)                 # .view(B, S, D)
    y = emb * attn_bsd                                   # x * attn_out
    pooled = jnp.max(y, axis=1)                          # torch.max(x, 1)[0]
    h = jnp.tanh(pooled @ p["w5"].T + p["b5"])
    return h @ p["wfc"].T + p["bfc"]


if __name__ == "__main__":
    key = jax.random.PRNGKey(0)
    pkey, xkey = jax.random.split(key)
    params = init_params(pkey)
    kparams = prepare_kernel_params(params)
    token_ids = jax.random.randint(xkey, (BATCH, SEQ), 0, VOCAB, dtype=jnp.int32)

    logits = text_mlp_forward(token_ids, kparams)
    logits = jax.block_until_ready(logits)
    assert logits.shape == (BATCH, LABELS)

    ref = reference_forward(token_ids, params)
    # tolerance slightly looser than 1e-4 because the softmax denominator uses the
    # EUP approximate reciprocal (pl.reciprocal(..., approx=True)) per the perf review
    np.testing.assert_allclose(np.asarray(logits), np.asarray(ref),
                               rtol=2e-3, atol=2e-3)
    print("KERNEL_OK")
</pallas_src>

<mosaic_0001>
module attributes {stable_mosaic.version = 11 : i64} {
  func.func @fused_text_mlp_kernel(%arg0: memref<16xi32, #tpu.memory_space<smem>>, %arg1: memref<64x128xf32, #tpu.memory_space<vmem>>, %arg2: memref<128x384xf32, #tpu.memory_space<vmem>>, %arg3: memref<1x384xf32, #tpu.memory_space<vmem>>, %arg4: memref<128x128xf32, #tpu.memory_space<vmem>>, %arg5: memref<1x128xf32, #tpu.memory_space<vmem>>, %arg6: memref<128x128xf32, #tpu.memory_space<vmem>>, %arg7: memref<1x128xf32, #tpu.memory_space<vmem>>, %arg8: memref<128x2xf32, #tpu.memory_space<vmem>>, %arg9: memref<1x2xf32, #tpu.memory_space<vmem>>, %arg10: memref<2x2xf32, #tpu.memory_space<vmem>>, %arg11: memref<16x128xf32, #tpu.memory_space<vmem>>, %arg12: memref<16x128xf32, #tpu.memory_space<vmem>>) attributes {dimension_semantics = [], scalar_prefetch = 0 : i64, scratch_operands = 2 : i64, tpu.core_type = #tpu.core_type<tc>} {
    %c0 = arith.constant 0 : index
    %0 = memref.load %arg0[%c0] : memref<16xi32, #tpu.memory_space<smem>>
    %1 = arith.index_cast %0 : i32 to index
    %c0_0 = arith.constant 0 : index
    %2 = vector.load %arg1[%1, %c0_0] : memref<64x128xf32, #tpu.memory_space<vmem>>, vector<1x128xf32>
    %c0_1 = arith.constant 0 : index
    %c0_2 = arith.constant 0 : index
    %3 = vector.load %arg11[%c0_1, %c0_2] : memref<16x128xf32, #tpu.memory_space<vmem>>, vector<1x128xf32>
    tpu.vector_store %arg11[%c0_1, %c0_2], %2 {strides = array<i32>} : memref<16x128xf32, #tpu.memory_space<vmem>>, vector<1x128xf32>,
    %c1 = arith.constant 1 : index
    %4 = memref.load %arg0[%c1] : memref<16xi32, #tpu.memory_space<smem>>
    %5 = arith.index_cast %4 : i32 to index
    %c0_3 = arith.constant 0 : index
    %6 = vector.load %arg1[%5, %c0_3] : memref<64x128xf32, #tpu.memory_space<vmem>>, vector<1x128xf32>
    %c8 = arith.constant 8 : index
    %c0_4 = arith.constant 0 : index
    %7 = vector.load %arg11[%c8, %c0_4] : memref<16x128xf32, #tpu.memory_space<vmem>>, vector<1x128xf32>
    tpu.vector_store %arg11[%c8, %c0_4], %6 {strides = array<i32>} : memref<16x128xf32, #tpu.memory_space<vmem>>, vector<1x128xf32>,
    %c2 = arith.constant 2 : index
    %8 = memref.load %arg0[%c2] : memref<16xi32, #tpu.memory_space<smem>>
    %9 = arith.index_cast %8 : i32 to index
    %c0_5 = arith.constant 0 : index
    %10 = vector.load %arg1[%9, %c0_5] : memref<64x128xf32, #tpu.memory_space<vmem>>, vector<1x128xf32>
    %c1_6 = arith.constant 1 : index
    %c0_7 = arith.constant 0 : index
    %11 = vector.load %arg11[%c1_6, %c0_7] : memref<16x128xf32, #tpu.memory_space<vmem>>, vector<1x128xf32>
    tpu.vector_store %arg11[%c1_6, %c0_7], %10 {strides = array<i32>} : memref<16x128xf32, #tpu.memory_space<vmem>>, vector<1x128xf32>,
    %c3 = arith.constant 3 : index
    %12 = memref.load %arg0[%c3] : memref<16xi32, #tpu.memory_space<smem>>
    %13 = arith.index_cast %12 : i32 to index
    %c0_8 = arith.constant 0 : index
    %14 = vector.load %arg1[%13, %c0_8] : memref<64x128xf32, #tpu.memory_space<vmem>>, vector<1x128xf32>
    %c9 = arith.constant 9 : index
    %c0_9 = arith.constant 0 : index
    %15 = vector.load %arg11[%c9, %c0_9] : memref<16x128xf32, #tpu.memory_space<vmem>>, vector<1x128xf32>
    tpu.vector_store %arg11[%c9, %c0_9], %14 {strides = array<i32>} : memref<16x128xf32, #tpu.memory_space<vmem>>, vector<1x128xf32>,
    %c4 = arith.constant 4 : index
    %16 = memref.load %arg0[%c4] : memref<16xi32, #tpu.memory_space<smem>>
    %17 = arith.index_cast %16 : i32 to index
    %c0_10 = arith.constant 0 : index
    %18 = vector.load %arg1[%17, %c0_10] : memref<64x128xf32, #tpu.memory_space<vmem>>, vector<1x128xf32>
    %c2_11 = arith.constant 2 : index
    %c0_12 = arith.constant 0 : index
    %19 = vector.load %arg11[%c2_11, %c0_12] : memref<16x128xf32, #tpu.memory_space<vmem>>, vector<1x128xf32>
    tpu.vector_store %arg11[%c2_11, %c0_12], %18 {strides = array<i32>} : memref<16x128xf32, #tpu.memory_space<vmem>>, vector<1x128xf32>,
    %c5 = arith.constant 5 : index
    %20 = memref.load %arg0[%c5] : memref<16xi32, #tpu.memory_space<smem>>
    %21 = arith.index_cast %20 : i32 to index
    %c0_13 = arith.constant 0 : index
    %22 = vector.load %arg1[%21, %c0_13] : memref<64x128xf32, #tpu.memory_space<vmem>>, vector<1x128xf32>
    %c10 = arith.constant 10 : index
    %c0_14 = arith.constant 0 : index
    %23 = vector.load %arg11[%c10, %c0_14] : memref<16x128xf32, #tpu.memory_space<vmem>>, vector<1x128xf32>
    tpu.vector_store %arg11[%c10, %c0_14], %22 {strides = array<i32>} : memref<16x128xf32, #tpu.memory_space<vmem>>, vector<1x128xf32>,
    %c6 = arith.constant 6 : index
    %24 = memref.load %arg0[%c6] : memref<16xi32, #tpu.memory_space<smem>>
    %25 = arith.index_cast %24 : i32 to index
    %c0_15 = arith.constant 0 : index
    %26 = vector.load %arg1[%25, %c0_15] : memref<64x128xf32, #tpu.memory_space<vmem>>, vector<1x128xf32>
    %c3_16 = arith.constant 3 : index
    %c0_17 = arith.constant 0 : index
    %27 = vector.load %arg11[%c3_16, %c0_17] : memref<16x128xf32, #tpu.memory_space<vmem>>, vector<1x128xf32>
    tpu.vector_store %arg11[%c3_16, %c0_17], %26 {strides = array<i32>} : memref<16x128xf32, #tpu.memory_space<vmem>>, vector<1x128xf32>,
    %c7 = arith.constant 7 : index
    %28 = memref.load %arg0[%c7] : memref<16xi32, #tpu.memory_space<smem>>
    %29 = arith.index_cast %28 : i32 to index
    %c0_18 = arith.constant 0 : index
    %30 = vector.load %arg1[%29, %c0_18] : memref<64x128xf32, #tpu.memory_space<vmem>>, vector<1x128xf32>
    %c11 = arith.constant 11 : index
    %c0_19 = arith.constant 0 : index
    %31 = vector.load %arg11[%c11, %c0_19] : memref<16x128xf32, #tpu.memory_space<vmem>>, vector<1x128xf32>
    tpu.vector_store %arg11[%c11, %c0_19], %30 {strides = array<i32>} : memref<16x128xf32, #tpu.memory_space<vmem>>, vector<1x128xf32>,
    %c8_20 = arith.constant 8 : index
    %32 = memref.load %arg0[%c8_20] : memref<16xi32, #tpu.memory_space<smem>>
    %33 = arith.index_cast %32 : i32 to index
    %c0_21 = arith.constant 0 : index
    %34 = vector.load %arg1[%33, %c0_21] : memref<64x128xf32, #tpu.memory_space<vmem>>, vector<1x128xf32>
    %c4_22 = arith.constant 4 : index
    %c0_23 = arith.constant 0 : index
    %35 = vector.load %arg11[%c4_22, %c0_23] : memref<16x128xf32, #tpu.memory_space<vmem>>, vector<1x128xf32>
    tpu.vector_store %arg11[%c4_22, %c0_23], %34 {strides = array<i32>} : memref<16x128xf32, #tpu.memory_space<vmem>>, vector<1x128xf32>,
    %c9_24 = arith.constant 9 : index
    %36 = memref.load %arg0[%c9_24] : memref<16xi32, #tpu.memory_space<smem>>
    %37 = arith.index_cast %36 : i32 to index
    %c0_25 = arith.constant 0 : index
    %38 = vector.load %arg1[%37, %c0_25] : memref<64x128xf32, #tpu.memory_space<vmem>>, vector<1x128xf32>
    %c12 = arith.constant 12 : index
    %c0_26 = arith.constant 0 : index
    %39 = vector.load %arg11[%c12, %c0_26] : memref<16x128xf32, #tpu.memory_space<vmem>>, vector<1x128xf32>
    tpu.vector_store %arg11[%c12, %c0_26], %38 {strides = array<i32>} : memref<16x128xf32, #tpu.memory_space<vmem>>, vector<1x128xf32>,
    %c10_27 = arith.constant 10 : index
    %40 = memref.load %arg0[%c10_27] : memref<16xi32, #tpu.memory_space<smem>>
    %41 = arith.index_cast %40 : i32 to index
    %c0_28 = arith.constant 0 : index
    %42 = vector.load %arg1[%41, %c0_28] : memref<64x128xf32, #tpu.memory_space<vmem>>, vector<1x128xf32>
    %c5_29 = arith.constant 5 : index
    %c0_30 = arith.constant 0 : index
    %43 = vector.load %arg11[%c5_29, %c0_30] : memref<16x128xf32, #tpu.memory_space<vmem>>, vector<1x128xf32>
    tpu.vector_store %arg11[%c5_29, %c0_30], %42 {strides = array<i32>} : memref<16x128xf32, #tpu.memory_space<vmem>>, vector<1x128xf32>,
    %c11_31 = arith.constant 11 : index
    %44 = memref.load %arg0[%c11_31] : memref<16xi32, #tpu.memory_space<smem>>
    %45 = arith.index_cast %44 : i32 to index
    %c0_32 = arith.constant 0 : index
    %46 = vector.load %arg1[%45, %c0_32] : memref<64x128xf32, #tpu.memory_space<vmem>>, vector<1x128xf32>
    %c13 = arith.constant 13 : index
    %c0_33 = arith.constant 0 : index
    %47 = vector.load %arg11[%c13, %c0_33] : memref<16x128xf32, #tpu.memory_space<vmem>>, vector<1x128xf32>
    tpu.vector_store %arg11[%c13, %c0_33], %46 {strides = array<i32>} : memref<16x128xf32, #tpu.memory_space<vmem>>, vector<1x128xf32>,
    %c12_34 = arith.constant 12 : index
    %48 = memref.load %arg0[%c12_34] : memref<16xi32, #tpu.memory_space<smem>>
    %49 = arith.index_cast %48 : i32 to index
    %c0_35 = arith.constant 0 : index
    %50 = vector.load %arg1[%49, %c0_35] : memref<64x128xf32, #tpu.memory_space<vmem>>, vector<1x128xf32>
    %c6_36 = arith.constant 6 : index
    %c0_37 = arith.constant 0 : index
    %51 = vector.load %arg11[%c6_36, %c0_37] : memref<16x128xf32, #tpu.memory_space<vmem>>, vector<1x128xf32>
    tpu.vector_store %arg11[%c6_36, %c0_37], %50 {strides = array<i32>} : memref<16x128xf32, #tpu.memory_space<vmem>>, vector<1x128xf32>,
    %c13_38 = arith.constant 13 : index
    %52 = memref.load %arg0[%c13_38] : memref<16xi32, #tpu.memory_space<smem>>
    %53 = arith.index_cast %52 : i32 to index
    %c0_39 = arith.constant 0 : index
    %54 = vector.load %arg1[%53, %c0_39] : memref<64x128xf32, #tpu.memory_space<vmem>>, vector<1x128xf32>
    %c14 = arith.constant 14 : index
    %c0_40 = arith.constant 0 : index
    %55 = vector.load %arg11[%c14, %c0_40] : memref<16x128xf32, #tpu.memory_space<vmem>>, vector<1x128xf32>
    tpu.vector_store %arg11[%c14, %c0_40], %54 {strides = array<i32>} : memref<16x128xf32, #tpu.memory_space<vmem>>, vector<1x128xf32>,
    %c14_41 = arith.constant 14 : index
    %56 = memref.load %arg0[%c14_41] : memref<16xi32, #tpu.memory_space<smem>>
    %57 = arith.index_cast %56 : i32 to index
    %c0_42 = arith.constant 0 : index
    %58 = vector.load %arg1[%57, %c0_42] : memref<64x128xf32, #tpu.memory_space<vmem>>, vector<1x128xf32>
    %c7_43 = arith.constant 7 : index
    %c0_44 = arith.constant 0 : index
    %59 = vector.load %arg11[%c7_43, %c0_44] : memref<16x128xf32, #tpu.memory_space<vmem>>, vector<1x128xf32>
    tpu.vector_store %arg11[%c7_43, %c0_44], %58 {strides = array<i32>} : memref<16x128xf32, #tpu.memory_space<vmem>>, vector<1x128xf32>,
    %c15 = arith.constant 15 : index
    %60 = memref.load %arg0[%c15] : memref<16xi32, #tpu.memory_space<smem>>
    %61 = arith.index_cast %60 : i32 to index
    %c0_45 = arith.constant 0 : index
    %62 = vector.load %arg1[%61, %c0_45] : memref<64x128xf32, #tpu.memory_space<vmem>>, vector<1x128xf32>
    %c15_46 = arith.constant 15 : index
    %c0_47 = arith.constant 0 : index
    %63 = vector.load %arg11[%c15_46, %c0_47] : memref<16x128xf32, #tpu.memory_space<vmem>>, vector<1x128xf32>
    tpu.vector_store %arg11[%c15_46, %c0_47], %62 {strides = array<i32>} : memref<16x128xf32, #tpu.memory_space<vmem>>, vector<1x128xf32>,
    %c0_48 = arith.constant 0 : index
    %c0_49 = arith.constant 0 : index
    %64 = vector.load %arg11[%c0_48, %c0_49] : memref<16x128xf32, #tpu.memory_space<vmem>>, vector<16x128xf32>
    %c0_50 = arith.constant 0 : index
    %c0_51 = arith.constant 0 : index
    %65 = vector.load %arg2[%c0_50, %c0_51] : memref<128x384xf32, #tpu.memory_space<vmem>>, vector<128x384xf32>
    %cst = arith.constant dense<0.000000e+00> : vector<16x384xf32>
    %66 = tpu.matmul %64, %65, %cst {dimension_numbers = #tpu.dot_dimension_numbers<[1], [0], [0], [1], [0, 0, 1, 1], [], []>} : vector<16x128xf32>, vector<128x384xf32>, vector<16x384xf32> -> vector<16x384xf32>
    %c0_52 = arith.constant 0 : index
    %c0_53 = arith.constant 0 : index
    %67 = vector.load %arg3[%c0_52, %c0_53] : memref<1x384xf32, #tpu.memory_space<vmem>>, vector<1x384xf32>
    %68 = vector.broadcast %67 : vector<1x384xf32> to vector<16x384xf32>
    %69 = arith.addf %66, %68 : vector<16x384xf32>
    %70 = vector.extract_strided_slice %69 {offsets = [0, 0], sizes = [8, 384], strides = [1, 1]} : vector<16x384xf32> to vector<8x384xf32>
    %71 = vector.extract_strided_slice %70 {offsets = [0, 0], sizes = [8, 128], strides = [1, 1]} : vector<8x384xf32> to vector<8x128xf32>
    %72 = vector.extract_strided_slice %70 {offsets = [0, 128], sizes = [8, 128], strides = [1, 1]} : vector<8x384xf32> to vector<8x128xf32>
    %73 = vector.extract_strided_slice %70 {offsets = [0, 256], sizes = [8, 128], strides = [1, 1]} : vector<8x384xf32> to vector<8x128xf32>
    %cst_54 = arith.constant 0.000000e+00 : f32
    %74 = vector.broadcast %cst_54 : f32 to vector<8x128xf32>
    %75 = vector.extract_strided_slice %71 {offsets = [0, 0], sizes = [8, 16], strides = [1, 1]} : vector<8x128xf32> to vector<8x16xf32>
    %76 = vector.extract_strided_slice %72 {offsets = [0, 0], sizes = [8, 16], strides = [1, 1]} : vector<8x128xf32> to vector<8x16xf32>
    %77 = vector.extract_strided_slice %73 {offsets = [0, 0], sizes = [8, 16], strides = [1, 1]} : vector<8x128xf32> to vector<8x16xf32>
    %cst_55 = arith.constant dense<0.000000e+00> : vector<8x8xf32>
    %78 = tpu.matmul %75, %76, %cst_55 {dimension_numbers = #tpu.dot_dimension_numbers<[1], [1], [0], [0], [0, 0, 1, 0], [], []>} : vector<8x16xf32>, vector<8x16xf32>, vector<8x8xf32> -> vector<8x8xf32>
    %cst_56 = arith.constant dense<0xFF800000> : vector<8xf32>
    %79 = vector.multi_reduction <maximumf>, %78, %cst_56 [1] : vector<8x8xf32> to vector<8xf32>
    %80 = vector.shape_cast %79 : vector<8xf32> to vector<8x1xf32>
    %81 = vector.broadcast %80 : vector<8x1xf32> to vector<8x8xf32>
    %82 = arith.subf %78, %81 : vector<8x8xf32>
    %83 = math.exp %82 : vector<8x8xf32>
    %cst_57 = arith.constant dense<0.000000e+00> : vector<8xf32>
    %84 = vector.multi_reduction <add>, %83, %cst_57 [1] : vector<8x8xf32> to vector<8xf32>
    %85 = vector.shape_cast %84 : vector<8xf32> to vector<8x1xf32>
    %86 = tpu.reciprocal %85 {approx = true} : vector<8x1xf32> -> vector<8x1xf32>
    %87 = vector.broadcast %86 : vector<8x1xf32> to vector<8x8xf32>
    %88 = arith.mulf %83, %87 : vector<8x8xf32>
    %cst_58 = arith.constant dense<0.000000e+00> : vector<8x16xf32>
    %89 = tpu.matmul %88, %77, %cst_58 {dimension_numbers = #tpu.dot_dimension_numbers<[1], [0], [0], [1], [0, 0, 1, 1], [], []>} : vector<8x8xf32>, vector<8x16xf32>, vector<8x16xf32> -> vector<8x16xf32>
    %c0_59 = arith.constant 0 : index
    %c0_60 = arith.constant 0 : index
    %90 = vector.load %arg4[%c0_59, %c0_60] : memref<128x128xf32, #tpu.memory_space<vmem>>, vector<16x128xf32>
    %cst_61 = arith.constant dense<0.000000e+00> : vector<8x128xf32>
    %91 = tpu.matmul %89, %90, %cst_61 {dimension_numbers = #tpu.dot_dimension_numbers<[1], [0], [0], [1], [0, 0, 1, 1], [], []>} : vector<8x16xf32>, vector<16x128xf32>, vector<8x128xf32> -> vector<8x128xf32>
    %92 = arith.addf %74, %91 : vector<8x128xf32>
    %93 = vector.extract_strided_slice %71 {offsets = [0, 16], sizes = [8, 16], strides = [1, 1]} : vector<8x128xf32> to vector<8x16xf32>
    %94 = vector.extract_strided_slice %72 {offsets = [0, 16], sizes = [8, 16], strides = [1, 1]} : vector<8x128xf32> to vector<8x16xf32>
    %95 = vector.extract_strided_slice %73 {offsets = [0, 16], sizes = [8, 16], strides = [1, 1]} : vector<8x128xf32> to vector<8x16xf32>
    %cst_62 = arith.constant dense<0.000000e+00> : vector<8x8xf32>
    %96 = tpu.matmul %93, %94, %cst_62 {dimension_numbers = #tpu.dot_dimension_numbers<[1], [1], [0], [0], [0, 0, 1, 0], [], []>} : vector<8x16xf32>, vector<8x16xf32>, vector<8x8xf32> -> vector<8x8xf32>
    %cst_63 = arith.constant dense<0xFF800000> : vector<8xf32>
    %97 = vector.multi_reduction <maximumf>, %96, %cst_63 [1] : vector<8x8xf32> to vector<8xf32>
    %98 = vector.shape_cast %97 : vector<8xf32> to vector<8x1xf32>
    %99 = vector.broadcast %98 : vector<8x1xf32> to vector<8x8xf32>
    %100 = arith.subf %96, %99 : vector<8x8xf32>
    %101 = math.exp %100 : vector<8x8xf32>
    %cst_64 = arith.constant dense<0.000000e+00> : vector<8xf32>
    %102 = vector.multi_reduction <add>, %101, %cst_64 [1] : vector<8x8xf32> to vector<8xf32>
    %103 = vector.shape_cast %102 : vector<8xf32> to vector<8x1xf32>
    %104 = tpu.reciprocal %103 {approx = true} : vector<8x1xf32> -> vector<8x1xf32>
    %105 = vector.broadcast %104 : vector<8x1xf32> to vector<8x8xf32>
    %106 = arith.mulf %101, %105 : vector<8x8xf32>
    %cst_65 = arith.constant dense<0.000000e+00> : vector<8x16xf32>
    %107 = tpu.matmul %106, %95, %cst_65 {dimension_numbers = #tpu.dot_dimension_numbers<[1], [0], [0], [1], [0, 0, 1, 1], [], []>} : vector<8x8xf32>, vector<8x16xf32>, vector<8x16xf32> -> vector<8x16xf32>
    %c16 = arith.constant 16 : index
    %c0_66 = arith.constant 0 : index
    %108 = vector.load %arg4[%c16, %c0_66] : memref<128x128xf32, #tpu.memory_space<vmem>>, vector<16x128xf32>
    %cst_67 = arith.constant dense<0.000000e+00> : vector<8x128xf32>
    %109 = tpu.matmul %107, %108, %cst_67 {dimension_numbers = #tpu.dot_dimension_numbers<[1], [0], [0], [1], [0, 0, 1, 1], [], []>} : vector<8x16xf32>, vector<16x128xf32>, vector<8x128xf32> -> vector<8x128xf32>
    %110 = arith.addf %92, %109 : vector<8x128xf32>
    %111 = vector.extract_strided_slice %71 {offsets = [0, 32], sizes = [8, 16], strides = [1, 1]} : vector<8x128xf32> to vector<8x16xf32>
    %112 = vector.extract_strided_slice %72 {offsets = [0, 32], sizes = [8, 16], strides = [1, 1]} : vector<8x128xf32> to vector<8x16xf32>
    %113 = vector.extract_strided_slice %73 {offsets = [0, 32], sizes = [8, 16], strides = [1, 1]} : vector<8x128xf32> to vector<8x16xf32>
    %cst_68 = arith.constant dense<0.000000e+00> : vector<8x8xf32>
    %114 = tpu.matmul %111, %112, %cst_68 {dimension_numbers = #tpu.dot_dimension_numbers<[1], [1], [0], [0], [0, 0, 1, 0], [], []>} : vector<8x16xf32>, vector<8x16xf32>, vector<8x8xf32> -> vector<8x8xf32>
    %cst_69 = arith.constant dense<0xFF800000> : vector<8xf32>
    %115 = vector.multi_reduction <maximumf>, %114, %cst_69 [1] : vector<8x8xf32> to vector<8xf32>
    %116 = vector.shape_cast %115 : vector<8xf32> to vector<8x1xf32>
    %117 = vector.broadcast %116 : vector<8x1xf32> to vector<8x8xf32>
    %118 = arith.subf %114, %117 : vector<8x8xf32>
    %119 = math.exp %118 : vector<8x8xf32>
    %cst_70 = arith.constant dense<0.000000e+00> : vector<8xf32>
    %120 = vector.multi_reduction <add>, %119, %cst_70 [1] : vector<8x8xf32> to vector<8xf32>
    %121 = vector.shape_cast %120 : vector<8xf32> to vector<8x1xf32>
    %122 = tpu.reciprocal %121 {approx = true} : vector<8x1xf32> -> vector<8x1xf32>
    %123 = vector.broadcast %122 : vector<8x1xf32> to vector<8x8xf32>
    %124 = arith.mulf %119, %123 : vector<8x8xf32>
    %cst_71 = arith.constant dense<0.000000e+00> : vector<8x16xf32>
    %125 = tpu.matmul %124, %113, %cst_71 {dimension_numbers = #tpu.dot_dimension_numbers<[1], [0], [0], [1], [0, 0, 1, 1], [], []>} : vector<8x8xf32>, vector<8x16xf32>, vector<8x16xf32> -> vector<8x16xf32>
    %c32 = arith.constant 32 : index
    %c0_72 = arith.constant 0 : index
    %126 = vector.load %arg4[%c32, %c0_72] : memref<128x128xf32, #tpu.memory_space<vmem>>, vector<16x128xf32>
    %cst_73 = arith.constant dense<0.000000e+00> : vector<8x128xf32>
    %127 = tpu.matmul %125, %126, %cst_73 {dimension_numbers = #tpu.dot_dimension_numbers<[1], [0], [0], [1], [0, 0, 1, 1], [], []>} : vector<8x16xf32>, vector<16x128xf32>, vector<8x128xf32> -> vector<8x128xf32>
    %128 = arith.addf %110, %127 : vector<8x128xf32>
    %129 = vector.extract_strided_slice %71 {offsets = [0, 48], sizes = [8, 16], strides = [1, 1]} : vector<8x128xf32> to vector<8x16xf32>
    %130 = vector.extract_strided_slice %72 {offsets = [0, 48], sizes = [8, 16], strides = [1, 1]} : vector<8x128xf32> to vector<8x16xf32>
    %131 = vector.extract_strided_slice %73 {offsets = [0, 48], sizes = [8, 16], strides = [1, 1]} : vector<8x128xf32> to vector<8x16xf32>
    %cst_74 = arith.constant dense<0.000000e+00> : vector<8x8xf32>
    %132 = tpu.matmul %129, %130, %cst_74 {dimension_numbers = #tpu.dot_dimension_numbers<[1], [1], [0], [0], [0, 0, 1, 0], [], []>} : vector<8x16xf32>, vector<8x16xf32>, vector<8x8xf32> -> vector<8x8xf32>
    %cst_75 = arith.constant dense<0xFF800000> : vector<8xf32>
    %133 = vector.multi_reduction <maximumf>, %132, %cst_75 [1] : vector<8x8xf32> to vector<8xf32>
    %134 = vector.shape_cast %133 : vector<8xf32> to vector<8x1xf32>
    %135 = vector.broadcast %134 : vector<8x1xf32> to vector<8x8xf32>
    %136 = arith.subf %132, %135 : vector<8x8xf32>
    %137 = math.exp %136 : vector<8x8xf32>
    %cst_76 = arith.constant dense<0.000000e+00> : vector<8xf32>
    %138 = vector.multi_reduction <add>, %137, %cst_76 [1] : vector<8x8xf32> to vector<8xf32>
    %139 = vector.shape_cast %138 : vector<8xf32> to vector<8x1xf32>
    %140 = tpu.reciprocal %139 {approx = true} : vector<8x1xf32> -> vector<8x1xf32>
    %141 = vector.broadcast %140 : vector<8x1xf32> to vector<8x8xf32>
    %142 = arith.mulf %137, %141 : vector<8x8xf32>
    %cst_77 = arith.constant dense<0.000000e+00> : vector<8x16xf32>
    %143 = tpu.matmul %142, %131, %cst_77 {dimension_numbers = #tpu.dot_dimension_numbers<[1], [0], [0], [1], [0, 0, 1, 1], [], []>} : vector<8x8xf32>, vector<8x16xf32>, vector<8x16xf32> -> vector<8x16xf32>
    %c48 = arith.constant 48 : index
    %c0_78 = arith.constant 0 : index
    %144 = vector.load %arg4[%c48, %c0_78] : memref<128x128xf32, #tpu.memory_space<vmem>>, vector<16x128xf32>
    %cst_79 = arith.constant dense<0.000000e+00> : vector<8x128xf32>
    %145 = tpu.matmul %143, %144, %cst_79 {dimension_numbers = #tpu.dot_dimension_numbers<[1], [0], [0], [1], [0, 0, 1, 1], [], []>} : vector<8x16xf32>, vector<16x128xf32>, vector<8x128xf32> -> vector<8x128xf32>
    %146 = arith.addf %128, %145 : vector<8x128xf32>
    %147 = vector.extract_strided_slice %71 {offsets = [0, 64], sizes = [8, 16], strides = [1, 1]} : vector<8x128xf32> to vector<8x16xf32>
    %148 = vector.extract_strided_slice %72 {offsets = [0, 64], sizes = [8, 16], strides = [1, 1]} : vector<8x128xf32> to vector<8x16xf32>
    %149 = vector.extract_strided_slice %73 {offsets = [0, 64], sizes = [8, 16], strides = [1, 1]} : vector<8x128xf32> to vector<8x16xf32>
    %cst_80 = arith.constant dense<0.000000e+00> : vector<8x8xf32>
    %150 = tpu.matmul %147, %148, %cst_80 {dimension_numbers = #tpu.dot_dimension_numbers<[1], [1], [0], [0], [0, 0, 1, 0], [], []>} : vector<8x16xf32>, vector<8x16xf32>, vector<8x8xf32> -> vector<8x8xf32>
    %cst_81 = arith.constant dense<0xFF800000> : vector<8xf32>
    %151 = vector.multi_reduction <maximumf>, %150, %cst_81 [1] : vector<8x8xf32> to vector<8xf32>
    %152 = vector.shape_cast %151 : vector<8xf32> to vector<8x1xf32>
    %153 = vector.broadcast %152 : vector<8x1xf32> to vector<8x8xf32>
    %154 = arith.subf %150, %153 : vector<8x8xf32>
    %155 = math.exp %154 : vector<8x8xf32>
    %cst_82 = arith.constant dense<0.000000e+00> : vector<8xf32>
    %156 = vector.multi_reduction <add>, %155, %cst_82 [1] : vector<8x8xf32> to vector<8xf32>
    %157 = vector.shape_cast %156 : vector<8xf32> to vector<8x1xf32>
    %158 = tpu.reciprocal %157 {approx = true} : vector<8x1xf32> -> vector<8x1xf32>
    %159 = vector.broadcast %158 : vector<8x1xf32> to vector<8x8xf32>
    %160 = arith.mulf %155, %159 : vector<8x8xf32>
    %cst_83 = arith.constant dense<0.000000e+00> : vector<8x16xf32>
    %161 = tpu.matmul %160, %149, %cst_83 {dimension_numbers = #tpu.dot_dimension_numbers<[1], [0], [0], [1], [0, 0, 1, 1], [], []>} : vector<8x8xf32>, vector<8x16xf32>, vector<8x16xf32> -> vector<8x16xf32>
    %c64 = arith.constant 64 : index
    %c0_84 = arith.constant 0 : index
    %162 = vector.load %arg4[%c64, %c0_84] : memref<128x128xf32, #tpu.memory_space<vmem>>, vector<16x128xf32>
    %cst_85 = arith.constant dense<0.000000e+00> : vector<8x128xf32>
    %163 = tpu.matmul %161, %162, %cst_85 {dimension_numbers = #tpu.dot_dimension_numbers<[1], [0], [0], [1], [0, 0, 1, 1], [], []>} : vector<8x16xf32>, vector<16x128xf32>, vector<8x128xf32> -> vector<8x128xf32>
    %164 = arith.addf %146, %163 : vector<8x128xf32>
    %165 = vector.extract_strided_slice %71 {offsets = [0, 80], sizes = [8, 16], strides = [1, 1]} : vector<8x128xf32> to vector<8x16xf32>
    %166 = vector.extract_strided_slice %72 {offsets = [0, 80], sizes = [8, 16], strides = [1, 1]} : vector<8x128xf32> to vector<8x16xf32>
    %167 = vector.extract_strided_slice %73 {offsets = [0, 80], sizes = [8, 16], strides = [1, 1]} : vector<8x128xf32> to vector<8x16xf32>
    %cst_86 = arith.constant dense<0.000000e+00> : vector<8x8xf32>
    %168 = tpu.matmul %165, %166, %cst_86 {dimension_numbers = #tpu.dot_dimension_numbers<[1], [1], [0], [0], [0, 0, 1, 0], [], []>} : vector<8x16xf32>, vector<8x16xf32>, vector<8x8xf32> -> vector<8x8xf32>
    %cst_87 = arith.constant dense<0xFF800000> : vector<8xf32>
    %169 = vector.multi_reduction <maximumf>, %168, %cst_87 [1] : vector<8x8xf32> to vector<8xf32>
    %170 = vector.shape_cast %169 : vector<8xf32> to vector<8x1xf32>
    %171 = vector.broadcast %170 : vector<8x1xf32> to vector<8x8xf32>
    %172 = arith.subf %168, %171 : vector<8x8xf32>
    %173 = math.exp %172 : vector<8x8xf32>
    %cst_88 = arith.constant dense<0.000000e+00> : vector<8xf32>
    %174 = vector.multi_reduction <add>, %173, %cst_88 [1] : vector<8x8xf32> to vector<8xf32>
    %175 = vector.shape_cast %174 : vector<8xf32> to vector<8x1xf32>
    %176 = tpu.reciprocal %175 {approx = true} : vector<8x1xf32> -> vector<8x1xf32>
    %177 = vector.broadcast %176 : vector<8x1xf32> to vector<8x8xf32>
    %178 = arith.mulf %173, %177 : vector<8x8xf32>
    %cst_89 = arith.constant dense<0.000000e+00> : vector<8x16xf32>
    %179 = tpu.matmul %178, %167, %cst_89 {dimension_numbers = #tpu.dot_dimension_numbers<[1], [0], [0], [1], [0, 0, 1, 1], [], []>} : vector<8x8xf32>, vector<8x16xf32>, vector<8x16xf32> -> vector<8x16xf32>
    %c80 = arith.constant 80 : index
    %c0_90 = arith.constant 0 : index
    %180 = vector.load %arg4[%c80, %c0_90] : memref<128x128xf32, #tpu.memory_space<vmem>>, vector<16x128xf32>
    %cst_91 = arith.constant dense<0.000000e+00> : vector<8x128xf32>
    %181 = tpu.matmul %179, %180, %cst_91 {dimension_numbers = #tpu.dot_dimension_numbers<[1], [0], [0], [1], [0, 0, 1, 1], [], []>} : vector<8x16xf32>, vector<16x128xf32>, vector<8x128xf32> -> vector<8x128xf32>
    %182 = arith.addf %164, %181 : vector<8x128xf32>
    %183 = vector.extract_strided_slice %71 {offsets = [0, 96], sizes = [8, 16], strides = [1, 1]} : vector<8x128xf32> to vector<8x16xf32>
    %184 = vector.extract_strided_slice %72 {offsets = [0, 96], sizes = [8, 16], strides = [1, 1]} : vector<8x128xf32> to vector<8x16xf32>
    %185 = vector.extract_strided_slice %73 {offsets = [0, 96], sizes = [8, 16], strides = [1, 1]} : vector<8x128xf32> to vector<8x16xf32>
    %cst_92 = arith.constant dense<0.000000e+00> : vector<8x8xf32>
    %186 = tpu.matmul %183, %184, %cst_92 {dimension_numbers = #tpu.dot_dimension_numbers<[1], [1], [0], [0], [0, 0, 1, 0], [], []>} : vector<8x16xf32>, vector<8x16xf32>, vector<8x8xf32> -> vector<8x8xf32>
    %cst_93 = arith.constant dense<0xFF800000> : vector<8xf32>
    %187 = vector.multi_reduction <maximumf>, %186, %cst_93 [1] : vector<8x8xf32> to vector<8xf32>
    %188 = vector.shape_cast %187 : vector<8xf32> to vector<8x1xf32>
    %189 = vector.broadcast %188 : vector<8x1xf32> to vector<8x8xf32>
    %190 = arith.subf %186, %189 : vector<8x8xf32>
    %191 = math.exp %190 : vector<8x8xf32>
    %cst_94 = arith.constant dense<0.000000e+00> : vector<8xf32>
    %192 = vector.multi_reduction <add>, %191, %cst_94 [1] : vector<8x8xf32> to vector<8xf32>
    %193 = vector.shape_cast %192 : vector<8xf32> to vector<8x1xf32>
    %194 = tpu.reciprocal %193 {approx = true} : vector<8x1xf32> -> vector<8x1xf32>
    %195 = vector.broadcast %194 : vector<8x1xf32> to vector<8x8xf32>
    %196 = arith.mulf %191, %195 : vector<8x8xf32>
    %cst_95 = arith.constant dense<0.000000e+00> : vector<8x16xf32>
    %197 = tpu.matmul %196, %185, %cst_95 {dimension_numbers = #tpu.dot_dimension_numbers<[1], [0], [0], [1], [0, 0, 1, 1], [], []>} : vector<8x8xf32>, vector<8x16xf32>, vector<8x16xf32> -> vector<8x16xf32>
    %c96 = arith.constant 96 : index
    %c0_96 = arith.constant 0 : index
    %198 = vector.load %arg4[%c96, %c0_96] : memref<128x128xf32, #tpu.memory_space<vmem>>, vector<16x128xf32>
    %cst_97 = arith.constant dense<0.000000e+00> : vector<8x128xf32>
    %199 = tpu.matmul %197, %198, %cst_97 {dimension_numbers = #tpu.dot_dimension_numbers<[1], [0], [0], [1], [0, 0, 1, 1], [], []>} : vector<8x16xf32>, vector<16x128xf32>, vector<8x128xf32> -> vector<8x128xf32>
    %200 = arith.addf %182, %199 : vector<8x128xf32>
    %201 = vector.extract_strided_slice %71 {offsets = [0, 112], sizes = [8, 16], strides = [1, 1]} : vector<8x128xf32> to vector<8x16xf32>
    %202 = vector.extract_strided_slice %72 {offsets = [0, 112], sizes = [8, 16], strides = [1, 1]} : vector<8x128xf32> to vector<8x16xf32>
    %203 = vector.extract_strided_slice %73 {offsets = [0, 112], sizes = [8, 16], strides = [1, 1]} : vector<8x128xf32> to vector<8x16xf32>
    %cst_98 = arith.constant dense<0.000000e+00> : vector<8x8xf32>
    %204 = tpu.matmul %201, %202, %cst_98 {dimension_numbers = #tpu.dot_dimension_numbers<[1], [1], [0], [0], [0, 0, 1, 0], [], []>} : vector<8x16xf32>, vector<8x16xf32>, vector<8x8xf32> -> vector<8x8xf32>
    %cst_99 = arith.constant dense<0xFF800000> : vector<8xf32>
    %205 = vector.multi_reduction <maximumf>, %204, %cst_99 [1] : vector<8x8xf32> to vector<8xf32>
    %206 = vector.shape_cast %205 : vector<8xf32> to vector<8x1xf32>
    %207 = vector.broadcast %206 : vector<8x1xf32> to vector<8x8xf32>
    %208 = arith.subf %204, %207 : vector<8x8xf32>
    %209 = math.exp %208 : vector<8x8xf32>
    %cst_100 = arith.constant dense<0.000000e+00> : vector<8xf32>
    %210 = vector.multi_reduction <add>, %209, %cst_100 [1] : vector<8x8xf32> to vector<8xf32>
    %211 = vector.shape_cast %210 : vector<8xf32> to vector<8x1xf32>
    %212 = tpu.reciprocal %211 {approx = true} : vector<8x1xf32> -> vector<8x1xf32>
    %213 = vector.broadcast %212 : vector<8x1xf32> to vector<8x8xf32>
    %214 = arith.mulf %209, %213 : vector<8x8xf32>
    %cst_101 = arith.constant dense<0.000000e+00> : vector<8x16xf32>
    %215 = tpu.matmul %214, %203, %cst_101 {dimension_numbers = #tpu.dot_dimension_numbers<[1], [0], [0], [1], [0, 0, 1, 1], [], []>} : vector<8x8xf32>, vector<8x16xf32>, vector<8x16xf32> -> vector<8x16xf32>
    %c112 = arith.constant 112 : index
    %c0_102 = arith.constant 0 : index
    %216 = vector.load %arg4[%c112, %c0_102] : memref<128x128xf32, #tpu.memory_space<vmem>>, vector<16x128xf32>
    %cst_103 = arith.constant dense<0.000000e+00> : vector<8x128xf32>
    %217 = tpu.matmul %215, %216, %cst_103 {dimension_numbers = #tpu.dot_dimension_numbers<[1], [0], [0], [1], [0, 0, 1, 1], [], []>} : vector<8x16xf32>, vector<16x128xf32>, vector<8x128xf32> -> vector<8x128xf32>
    %218 = arith.addf %200, %217 : vector<8x128xf32>
    %c0_104 = arith.constant 0 : index
    %c0_105 = arith.constant 0 : index
    %219 = vector.load %arg5[%c0_104, %c0_105] : memref<1x128xf32, #tpu.memory_space<vmem>>, vector<1x128xf32>
    %220 = vector.broadcast %219 : vector<1x128xf32> to vector<8x128xf32>
    %221 = arith.addf %218, %220 : vector<8x128xf32>
    %c0_106 = arith.constant 0 : index
    %c0_107 = arith.constant 0 : index
    %222 = vector.load %arg11[%c0_106, %c0_107] : memref<16x128xf32, #tpu.memory_space<vmem>>, vector<8x128xf32>
    %223 = arith.mulf %222, %221 : vector<8x128xf32>
    %224 = vector.extract_strided_slice %223 {offsets = [0, 0], sizes = [1, 128], strides = [1, 1]} : vector<8x128xf32> to vector<1x128xf32>
    %c0_108 = arith.constant 0 : index
    %c0_109 = arith.constant 0 : index
    %225 = vector.load %arg12[%c0_108, %c0_109] : memref<16x128xf32, #tpu.memory_space<vmem>>, vector<1x128xf32>
    tpu.vector_store %arg12[%c0_108, %c0_109], %224 {strides = array<i32>} : memref<16x128xf32, #tpu.memory_space<vmem>>, vector<1x128xf32>,
    %226 = vector.extract_strided_slice %223 {offsets = [1, 0], sizes = [1, 128], strides = [1, 1]} : vector<8x128xf32> to vector<1x128xf32>
    %c2_110 = arith.constant 2 : index
    %c0_111 = arith.constant 0 : index
    %227 = vector.load %arg12[%c2_110, %c0_111] : memref<16x128xf32, #tpu.memory_space<vmem>>, vector<1x128xf32>
    tpu.vector_store %arg12[%c2_110, %c0_111], %226 {strides = array<i32>} : memref<16x128xf32, #tpu.memory_space<vmem>>, vector<1x128xf32>,
    %228 = vector.extract_strided_slice %223 {offsets = [2, 0], sizes = [1, 128], strides = [1, 1]} : vector<8x128xf32> to vector<1x128xf32>
    %c4_112 = arith.constant 4 : index
    %c0_113 = arith.constant 0 : index
    %229 = vector.load %arg12[%c4_112, %c0_113] : memref<16x128xf32, #tpu.memory_space<vmem>>, vector<1x128xf32>
    tpu.vector_store %arg12[%c4_112, %c0_113], %228 {strides = array<i32>} : memref<16x128xf32, #tpu.memory_space<vmem>>, vector<1x128xf32>,
    %230 = vector.extract_strided_slice %223 {offsets = [3, 0], sizes = [1, 128], strides = [1, 1]} : vector<8x128xf32> to vector<1x128xf32>
    %c6_114 = arith.constant 6 : index
    %c0_115 = arith.constant 0 : index
    %231 = vector.load %arg12[%c6_114, %c0_115] : memref<16x128xf32, #tpu.memory_space<vmem>>, vector<1x128xf32>
    tpu.vector_store %arg12[%c6_114, %c0_115], %230 {strides = array<i32>} : memref<16x128xf32, #tpu.memory_space<vmem>>, vector<1x128xf32>,
    %232 = vector.extract_strided_slice %223 {offsets = [4, 0], sizes = [1, 128], strides = [1, 1]} : vector<8x128xf32> to vector<1x128xf32>
    %c8_116 = arith.constant 8 : index
    %c0_117 = arith.constant 0 : index
    %233 = vector.load %arg12[%c8_116, %c0_117] : memref<16x128xf32, #tpu.memory_space<vmem>>, vector<1x128xf32>
    tpu.vector_store %arg12[%c8_116, %c0_117], %232 {strides = array<i32>} : memref<16x128xf32, #tpu.memory_space<vmem>>, vector<1x128xf32>,
    %234 = vector.extract_strided_slice %223 {offsets = [5, 0], sizes = [1, 128], strides = [1, 1]} : vector<8x128xf32> to vector<1x128xf32>
    %c10_118 = arith.constant 10 : index
    %c0_119 = arith.constant 0 : index
    %235 = vector.load %arg12[%c10_118, %c0_119] : memref<16x128xf32, #tpu.memory_space<vmem>>, vector<1x128xf32>
    tpu.vector_store %arg12[%c10_118, %c0_119], %234 {strides = array<i32>} : memref<16x128xf32, #tpu.memory_space<vmem>>, vector<1x128xf32>,
    %236 = vector.extract_strided_slice %223 {offsets = [6, 0], sizes = [1, 128], strides = [1, 1]} : vector<8x128xf32> to vector<1x128xf32>
    %c12_120 = arith.constant 12 : index
    %c0_121 = arith.constant 0 : index
    %237 = vector.load %arg12[%c12_120, %c0_121] : memref<16x128xf32, #tpu.memory_space<vmem>>, vector<1x128xf32>
    tpu.vector_store %arg12[%c12_120, %c0_121], %236 {strides = array<i32>} : memref<16x128xf32, #tpu.memory_space<vmem>>, vector<1x128xf32>,
    %238 = vector.extract_strided_slice %223 {offsets = [7, 0], sizes = [1, 128], strides = [1, 1]} : vector<8x128xf32> to vector<1x128xf32>
    %c14_122 = arith.constant 14 : index
    %c0_123 = arith.constant 0 : index
    %239 = vector.load %arg12[%c14_122, %c0_123] : memref<16x128xf32, #tpu.memory_space<vmem>>, vector<1x128xf32>
    tpu.vector_store %arg12[%c14_122, %c0_123], %238 {strides = array<i32>} : memref<16x128xf32, #tpu.memory_space<vmem>>, vector<1x128xf32>,
    %240 = vector.extract_strided_slice %69 {offsets = [8, 0], sizes = [8, 384], strides = [1, 1]} : vector<16x384xf32> to vector<8x384xf32>
    %241 = vector.extract_strided_slice %240 {offsets = [0, 0], sizes = [8, 128], strides = [1, 1]} : vector<8x384xf32> to vector<8x128xf32>
    %242 = vector.extract_strided_slice %240 {offsets = [0, 128], sizes = [8, 128], strides = [1, 1]} : vector<8x384xf32> to vector<8x128xf32>
    %243 = vector.extract_strided_slice %240 {offsets = [0, 256], sizes = [8, 128], strides = [1, 1]} : vector<8x384xf32> to vector<8x128xf32>
    %cst_124 = arith.constant 0.000000e+00 : f32
    %244 = vector.broadcast %cst_124 : f32 to vector<8x128xf32>
    %245 = vector.extract_strided_slice %241 {offsets = [0, 0], sizes = [8, 16], strides = [1, 1]} : vector<8x128xf32> to vector<8x16xf32>
    %246 = vector.extract_strided_slice %242 {offsets = [0, 0], sizes = [8, 16], strides = [1, 1]} : vector<8x128xf32> to vector<8x16xf32>
    %247 = vector.extract_strided_slice %243 {offsets = [0, 0], sizes = [8, 16], strides = [1, 1]} : vector<8x128xf32> to vector<8x16xf32>
    %cst_125 = arith.constant dense<0.000000e+00> : vector<8x8xf32>
    %248 = tpu.matmul %245, %246, %cst_125 {dimension_numbers = #tpu.dot_dimension_numbers<[1], [1], [0], [0], [0, 0, 1, 0], [], []>} : vector<8x16xf32>, vector<8x16xf32>, vector<8x8xf32> -> vector<8x8xf32>
    %cst_126 = arith.constant dense<0xFF800000> : vector<8xf32>
    %249 = vector.multi_reduction <maximumf>, %248, %cst_126 [1] : vector<8x8xf32> to vector<8xf32>
    %250 = vector.shape_cast %249 : vector<8xf32> to vector<8x1xf32>
    %251 = vector.broadcast %250 : vector<8x1xf32> to vector<8x8xf32>
    %252 = arith.subf %248, %251 : vector<8x8xf32>
    %253 = math.exp %252 : vector<8x8xf32>
    %cst_127 = arith.constant dense<0.000000e+00> : vector<8xf32>
    %254 = vector.multi_reduction <add>, %253, %cst_127 [1] : vector<8x8xf32> to vector<8xf32>
    %255 = vector.shape_cast %254 : vector<8xf32> to vector<8x1xf32>
    %256 = tpu.reciprocal %255 {approx = true} : vector<8x1xf32> -> vector<8x1xf32>
    %257 = vector.broadcast %256 : vector<8x1xf32> to vector<8x8xf32>
    %258 = arith.mulf %253, %257 : vector<8x8xf32>
    %cst_128 = arith.constant dense<0.000000e+00> : vector<8x16xf32>
    %259 = tpu.matmul %258, %247, %cst_128 {dimension_numbers = #tpu.dot_dimension_numbers<[1], [0], [0], [1], [0, 0, 1, 1], [], []>} : vector<8x8xf32>, vector<8x16xf32>, vector<8x16xf32> -> vector<8x16xf32>
    %c0_129 = arith.constant 0 : index
    %c0_130 = arith.constant 0 : index
    %260 = vector.load %arg4[%c0_129, %c0_130] : memref<128x128xf32, #tpu.memory_space<vmem>>, vector<16x128xf32>
    %cst_131 = arith.constant dense<0.000000e+00> : vector<8x128xf32>
    %261 = tpu.matmul %259, %260, %cst_131 {dimension_numbers = #tpu.dot_dimension_numbers<[1], [0], [0], [1], [0, 0, 1, 1], [], []>} : vector<8x16xf32>, vector<16x128xf32>, vector<8x128xf32> -> vector<8x128xf32>
    %262 = arith.addf %244, %261 : vector<8x128xf32>
    %263 = vector.extract_strided_slice %241 {offsets = [0, 16], sizes = [8, 16], strides = [1, 1]} : vector<8x128xf32> to vector<8x16xf32>
    %264 = vector.extract_strided_slice %242 {offsets = [0, 16], sizes = [8, 16], strides = [1, 1]} : vector<8x128xf32> to vector<8x16xf32>
    %265 = vector.extract_strided_slice %243 {offsets = [0, 16], sizes = [8, 16], strides = [1, 1]} : vector<8x128xf32> to vector<8x16xf32>
    %cst_132 = arith.constant dense<0.000000e+00> : vector<8x8xf32>
    %266 = tpu.matmul %263, %264, %cst_132 {dimension_numbers = #tpu.dot_dimension_numbers<[1], [1], [0], [0], [0, 0, 1, 0], [], []>} : vector<8x16xf32>, vector<8x16xf32>, vector<8x8xf32> -> vector<8x8xf32>
    %cst_133 = arith.constant dense<0xFF800000> : vector<8xf32>
    %267 = vector.multi_reduction <maximumf>, %266, %cst_133 [1] : vector<8x8xf32> to vector<8xf32>
    %268 = vector.shape_cast %267 : vector<8xf32> to vector<8x1xf32>
    %269 = vector.broadcast %268 : vector<8x1xf32> to vector<8x8xf32>
    %270 = arith.subf %266, %269 : vector<8x8xf32>
    %271 = math.exp %270 : vector<8x8xf32>
    %cst_134 = arith.constant dense<0.000000e+00> : vector<8xf32>
    %272 = vector.multi_reduction <add>, %271, %cst_134 [1] : vector<8x8xf32> to vector<8xf32>
    %273 = vector.shape_cast %272 : vector<8xf32> to vector<8x1xf32>
    %274 = tpu.reciprocal %273 {approx = true} : vector<8x1xf32> -> vector<8x1xf32>
    %275 = vector.broadcast %274 : vector<8x1xf32> to vector<8x8xf32>
    %276 = arith.mulf %271, %275 : vector<8x8xf32>
    %cst_135 = arith.constant dense<0.000000e+00> : vector<8x16xf32>
    %277 = tpu.matmul %276, %265, %cst_135 {dimension_numbers = #tpu.dot_dimension_numbers<[1], [0], [0], [1], [0, 0, 1, 1], [], []>} : vector<8x8xf32>, vector<8x16xf32>, vector<8x16xf32> -> vector<8x16xf32>
    %c16_136 = arith.constant 16 : index
    %c0_137 = arith.constant 0 : index
    %278 = vector.load %arg4[%c16_136, %c0_137] : memref<128x128xf32, #tpu.memory_space<vmem>>, vector<16x128xf32>
    %cst_138 = arith.constant dense<0.000000e+00> : vector<8x128xf32>
    %279 = tpu.matmul %277, %278, %cst_138 {dimension_numbers = #tpu.dot_dimension_numbers<[1], [0], [0], [1], [0, 0, 1, 1], [], []>} : vector<8x16xf32>, vector<16x128xf32>, vector<8x128xf32> -> vector<8x128xf32>
    %280 = arith.addf %262, %279 : vector<8x128xf32>
    %281 = vector.extract_strided_slice %241 {offsets = [0, 32], sizes = [8, 16], strides = [1, 1]} : vector<8x128xf32> to vector<8x16xf32>
    %282 = vector.extract_strided_slice %242 {offsets = [0, 32], sizes = [8, 16], strides = [1, 1]} : vector<8x128xf32> to vector<8x16xf32>
    %283 = vector.extract_strided_slice %243 {offsets = [0, 32], sizes = [8, 16], strides = [1, 1]} : vector<8x128xf32> to vector<8x16xf32>
    %cst_139 = arith.constant dense<0.000000e+00> : vector<8x8xf32>
    %284 = tpu.matmul %281, %282, %cst_139 {dimension_numbers = #tpu.dot_dimension_numbers<[1], [1], [0], [0], [0, 0, 1, 0], [], []>} : vector<8x16xf32>, vector<8x16xf32>, vector<8x8xf32> -> vector<8x8xf32>
    %cst_140 = arith.constant dense<0xFF800000> : vector<8xf32>
    %285 = vector.multi_reduction <maximumf>, %284, %cst_140 [1] : vector<8x8xf32> to vector<8xf32>
    %286 = vector.shape_cast %285 : vector<8xf32> to vector<8x1xf32>
    %287 = vector.broadcast %286 : vector<8x1xf32> to vector<8x8xf32>
    %288 = arith.subf %284, %287 : vector<8x8xf32>
    %289 = math.exp %288 : vector<8x8xf32>
    %cst_141 = arith.constant dense<0.000000e+00> : vector<8xf32>
    %290 = vector.multi_reduction <add>, %289, %cst_141 [1] : vector<8x8xf32> to vector<8xf32>
    %291 = vector.shape_cast %290 : vector<8xf32> to vector<8x1xf32>
    %292 = tpu.reciprocal %291 {approx = true} : vector<8x1xf32> -> vector<8x1xf32>
    %293 = vector.broadcast %292 : vector<8x1xf32> to vector<8x8xf32>
    %294 = arith.mulf %289, %293 : vector<8x8xf32>
    %cst_142 = arith.constant dense<0.000000e+00> : vector<8x16xf32>
    %295 = tpu.matmul %294, %283, %cst_142 {dimension_numbers = #tpu.dot_dimension_numbers<[1], [0], [0], [1], [0, 0, 1, 1], [], []>} : vector<8x8xf32>, vector<8x16xf32>, vector<8x16xf32> -> vector<8x16xf32>
    %c32_143 = arith.constant 32 : index
    %c0_144 = arith.constant 0 : index
    %296 = vector.load %arg4[%c32_143, %c0_144] : memref<128x128xf32, #tpu.memory_space<vmem>>, vector<16x128xf32>
    %cst_145 = arith.constant dense<0.000000e+00> : vector<8x128xf32>
    %297 = tpu.matmul %295, %296, %cst_145 {dimension_numbers = #tpu.dot_dimension_numbers<[1], [0], [0], [1], [0, 0, 1, 1], [], []>} : vector<8x16xf32>, vector<16x128xf32>, vector<8x128xf32> -> vector<8x128xf32>
    %298 = arith.addf %280, %297 : vector<8x128xf32>
    %299 = vector.extract_strided_slice %241 {offsets = [0, 48], sizes = [8, 16], strides = [1, 1]} : vector<8x128xf32> to vector<8x16xf32>
    %300 = vector.extract_strided_slice %242 {offsets = [0, 48], sizes = [8, 16], strides = [1, 1]} : vector<8x128xf32> to vector<8x16xf32>
    %301 = vector.extract_strided_slice %243 {offsets = [0, 48], sizes = [8, 16], strides = [1, 1]} : vector<8x128xf32> to vector<8x16xf32>
    %cst_146 = arith.constant dense<0.000000e+00> : vector<8x8xf32>
    %302 = tpu.matmul %299, %300, %cst_146 {dimension_numbers = #tpu.dot_dimension_numbers<[1], [1], [0], [0], [0, 0, 1, 0], [], []>} : vector<8x16xf32>, vector<8x16xf32>, vector<8x8xf32> -> vector<8x8xf32>
    %cst_147 = arith.constant dense<0xFF800000> : vector<8xf32>
    %303 = vector.multi_reduction <maximumf>, %302, %cst_147 [1] : vector<8x8xf32> to vector<8xf32>
    %304 = vector.shape_cast %303 : vector<8xf32> to vector<8x1xf32>
    %305 = vector.broadcast %304 : vector<8x1xf32> to vector<8x8xf32>
    %306 = arith.subf %302, %305 : vector<8x8xf32>
    %307 = math.exp %306 : vector<8x8xf32>
    %cst_148 = arith.constant dense<0.000000e+00> : vector<8xf32>
    %308 = vector.multi_reduction <add>, %307, %cst_148 [1] : vector<8x8xf32> to vector<8xf32>
    %309 = vector.shape_cast %308 : vector<8xf32> to vector<8x1xf32>
    %310 = tpu.reciprocal %309 {approx = true} : vector<8x1xf32> -> vector<8x1xf32>
    %311 = vector.broadcast %310 : vector<8x1xf32> to vector<8x8xf32>
    %312 = arith.mulf %307, %311 : vector<8x8xf32>
    %cst_149 = arith.constant dense<0.000000e+00> : vector<8x16xf32>
    %313 = tpu.matmul %312, %301, %cst_149 {dimension_numbers = #tpu.dot_dimension_numbers<[1], [0], [0], [1], [0, 0, 1, 1], [], []>} : vector<8x8xf32>, vector<8x16xf32>, vector<8x16xf32> -> vector<8x16xf32>
    %c48_150 = arith.constant 48 : index
    %c0_151 = arith.constant 0 : index
    %314 = vector.load %arg4[%c48_150, %c0_151] : memref<128x128xf32, #tpu.memory_space<vmem>>, vector<16x128xf32>
    %cst_152 = arith.constant dense<0.000000e+00> : vector<8x128xf32>
    %315 = tpu.matmul %313, %314, %cst_152 {dimension_numbers = #tpu.dot_dimension_numbers<[1], [0], [0], [1], [0, 0, 1, 1], [], []>} : vector<8x16xf32>, vector<16x128xf32>, vector<8x128xf32> -> vector<8x128xf32>
    %316 = arith.addf %298, %315 : vector<8x128xf32>
    %317 = vector.extract_strided_slice %241 {offsets = [0, 64], sizes = [8, 16], strides = [1, 1]} : vector<8x128xf32> to vector<8x16xf32>
    %318 = vector.extract_strided_slice %242 {offsets = [0, 64], sizes = [8, 16], strides = [1, 1]} : vector<8x128xf32> to vector<8x16xf32>
    %319 = vector.extract_strided_slice %243 {offsets = [0, 64], sizes = [8, 16], strides = [1, 1]} : vector<8x128xf32> to vector<8x16xf32>
    %cst_153 = arith.constant dense<0.000000e+00> : vector<8x8xf32>
    %320 = tpu.matmul %317, %318, %cst_153 {dimension_numbers = #tpu.dot_dimension_numbers<[1], [1], [0], [0], [0, 0, 1, 0], [], []>} : vector<8x16xf32>, vector<8x16xf32>, vector<8x8xf32> -> vector<8x8xf32>
    %cst_154 = arith.constant dense<0xFF800000> : vector<8xf32>
    %321 = vector.multi_reduction <maximumf>, %320, %cst_154 [1] : vector<8x8xf32> to vector<8xf32>
    %322 = vector.shape_cast %321 : vector<8xf32> to vector<8x1xf32>
    %323 = vector.broadcast %322 : vector<8x1xf32> to vector<8x8xf32>
    %324 = arith.subf %320, %323 : vector<8x8xf32>
    %325 = math.exp %324 : vector<8x8xf32>
    %cst_155 = arith.constant dense<0.000000e+00> : vector<8xf32>
    %326 = vector.multi_reduction <add>, %325, %cst_155 [1] : vector<8x8xf32> to vector<8xf32>
    %327 = vector.shape_cast %326 : vector<8xf32> to vector<8x1xf32>
    %328 = tpu.reciprocal %327 {approx = true} : vector<8x1xf32> -> vector<8x1xf32>
    %329 = vector.broadcast %328 : vector<8x1xf32> to vector<8x8xf32>
    %330 = arith.mulf %325, %329 : vector<8x8xf32>
    %cst_156 = arith.constant dense<0.000000e+00> : vector<8x16xf32>
    %331 = tpu.matmul %330, %319, %cst_156 {dimension_numbers = #tpu.dot_dimension_numbers<[1], [0], [0], [1], [0, 0, 1, 1], [], []>} : vector<8x8xf32>, vector<8x16xf32>, vector<8x16xf32> -> vector<8x16xf32>
    %c64_157 = arith.constant 64 : index
    %c0_158 = arith.constant 0 : index
    %332 = vector.load %arg4[%c64_157, %c0_158] : memref<128x128xf32, #tpu.memory_space<vmem>>, vector<16x128xf32>
    %cst_159 = arith.constant dense<0.000000e+00> : vector<8x128xf32>
    %333 = tpu.matmul %331, %332, %cst_159 {dimension_numbers = #tpu.dot_dimension_numbers<[1], [0], [0], [1], [0, 0, 1, 1], [], []>} : vector<8x16xf32>, vector<16x128xf32>, vector<8x128xf32> -> vector<8x128xf32>
    %334 = arith.addf %316, %333 : vector<8x128xf32>
    %335 = vector.extract_strided_slice %241 {offsets = [0, 80], sizes = [8, 16], strides = [1, 1]} : vector<8x128xf32> to vector<8x16xf32>
    %336 = vector.extract_strided_slice %242 {offsets = [0, 80], sizes = [8, 16], strides = [1, 1]} : vector<8x128xf32> to vector<8x16xf32>
    %337 = vector.extract_strided_slice %243 {offsets = [0, 80], sizes = [8, 16], strides = [1, 1]} : vector<8x128xf32> to vector<8x16xf32>
    %cst_160 = arith.constant dense<0.000000e+00> : vector<8x8xf32>
    %338 = tpu.matmul %335, %336, %cst_160 {dimension_numbers = #tpu.dot_dimension_numbers<[1], [1], [0], [0], [0, 0, 1, 0], [], []>} : vector<8x16xf32>, vector<8x16xf32>, vector<8x8xf32> -> vector<8x8xf32>
    %cst_161 = arith.constant dense<0xFF800000> : vector<8xf32>
    %339 = vector.multi_reduction <maximumf>, %338, %cst_161 [1] : vector<8x8xf32> to vector<8xf32>
    %340 = vector.shape_cast %339 : vector<8xf32> to vector<8x1xf32>
    %341 = vector.broadcast %340 : vector<8x1xf32> to vector<8x8xf32>
    %342 = arith.subf %338, %341 : vector<8x8xf32>
    %343 = math.exp %342 : vector<8x8xf32>
    %cst_162 = arith.constant dense<0.000000e+00> : vector<8xf32>
    %344 = vector.multi_reduction <add>, %343, %cst_162 [1] : vector<8x8xf32> to vector<8xf32>
    %345 = vector.shape_cast %344 : vector<8xf32> to vector<8x1xf32>
    %346 = tpu.reciprocal %345 {approx = true} : vector<8x1xf32> -> vector<8x1xf32>
    %347 = vector.broadcast %346 : vector<8x1xf32> to vector<8x8xf32>
    %348 = arith.mulf %343, %347 : vector<8x8xf32>
    %cst_163 = arith.constant dense<0.000000e+00> : vector<8x16xf32>
    %349 = tpu.matmul %348, %337, %cst_163 {dimension_numbers = #tpu.dot_dimension_numbers<[1], [0], [0], [1], [0, 0, 1, 1], [], []>} : vector<8x8xf32>, vector<8x16xf32>, vector<8x16xf32> -> vector<8x16xf32>
    %c80_164 = arith.constant 80 : index
    %c0_165 = arith.constant 0 : index
    %350 = vector.load %arg4[%c80_164, %c0_165] : memref<128x128xf32, #tpu.memory_space<vmem>>, vector<16x128xf32>
    %cst_166 = arith.constant dense<0.000000e+00> : vector<8x128xf32>
    %351 = tpu.matmul %349, %350, %cst_166 {dimension_numbers = #tpu.dot_dimension_numbers<[1], [0], [0], [1], [0, 0, 1, 1], [], []>} : vector<8x16xf32>, vector<16x128xf32>, vector<8x128xf32> -> vector<8x128xf32>
    %352 = arith.addf %334, %351 : vector<8x128xf32>
    %353 = vector.extract_strided_slice %241 {offsets = [0, 96], sizes = [8, 16], strides = [1, 1]} : vector<8x128xf32> to vector<8x16xf32>
    %354 = vector.extract_strided_slice %242 {offsets = [0, 96], sizes = [8, 16], strides = [1, 1]} : vector<8x128xf32> to vector<8x16xf32>
    %355 = vector.extract_strided_slice %243 {offsets = [0, 96], sizes = [8, 16], strides = [1, 1]} : vector<8x128xf32> to vector<8x16xf32>
    %cst_167 = arith.constant dense<0.000000e+00> : vector<8x8xf32>
    %356 = tpu.matmul %353, %354, %cst_167 {dimension_numbers = #tpu.dot_dimension_numbers<[1], [1], [0], [0], [0, 0, 1, 0], [], []>} : vector<8x16xf32>, vector<8x16xf32>, vector<8x8xf32> -> vector<8x8xf32>
    %cst_168 = arith.constant dense<0xFF800000> : vector<8xf32>
    %357 = vector.multi_reduction <maximumf>, %356, %cst_168 [1] : vector<8x8xf32> to vector<8xf32>
    %358 = vector.shape_cast %357 : vector<8xf32> to vector<8x1xf32>
    %359 = vector.broadcast %358 : vector<8x1xf32> to vector<8x8xf32>
    %360 = arith.subf %356, %359 : vector<8x8xf32>
    %361 = math.exp %360 : vector<8x8xf32>
    %cst_169 = arith.constant dense<0.000000e+00> : vector<8xf32>
    %362 = vector.multi_reduction <add>, %361, %cst_169 [1] : vector<8x8xf32> to vector<8xf32>
    %363 = vector.shape_cast %362 : vector<8xf32> to vector<8x1xf32>
    %364 = tpu.reciprocal %363 {approx = true} : vector<8x1xf32> -> vector<8x1xf32>
    %365 = vector.broadcast %364 : vector<8x1xf32> to vector<8x8xf32>
    %366 = arith.mulf %361, %365 : vector<8x8xf32>
    %cst_170 = arith.constant dense<0.000000e+00> : vector<8x16xf32>
    %367 = tpu.matmul %366, %355, %cst_170 {dimension_numbers = #tpu.dot_dimension_numbers<[1], [0], [0], [1], [0, 0, 1, 1], [], []>} : vector<8x8xf32>, vector<8x16xf32>, vector<8x16xf32> -> vector<8x16xf32>
    %c96_171 = arith.constant 96 : index
    %c0_172 = arith.constant 0 : index
    %368 = vector.load %arg4[%c96_171, %c0_172] : memref<128x128xf32, #tpu.memory_space<vmem>>, vector<16x128xf32>
    %cst_173 = arith.constant dense<0.000000e+00> : vector<8x128xf32>
    %369 = tpu.matmul %367, %368, %cst_173 {dimension_numbers = #tpu.dot_dimension_numbers<[1], [0], [0], [1], [0, 0, 1, 1], [], []>} : vector<8x16xf32>, vector<16x128xf32>, vector<8x128xf32> -> vector<8x128xf32>
    %370 = arith.addf %352, %369 : vector<8x128xf32>
    %371 = vector.extract_strided_slice %241 {offsets = [0, 112], sizes = [8, 16], strides = [1, 1]} : vector<8x128xf32> to vector<8x16xf32>
    %372 = vector.extract_strided_slice %242 {offsets = [0, 112], sizes = [8, 16], strides = [1, 1]} : vector<8x128xf32> to vector<8x16xf32>
    %373 = vector.extract_strided_slice %243 {offsets = [0, 112], sizes = [8, 16], strides = [1, 1]} : vector<8x128xf32> to vector<8x16xf32>
    %cst_174 = arith.constant dense<0.000000e+00> : vector<8x8xf32>
    %374 = tpu.matmul %371, %372, %cst_174 {dimension_numbers = #tpu.dot_dimension_numbers<[1], [1], [0], [0], [0, 0, 1, 0], [], []>} : vector<8x16xf32>, vector<8x16xf32>, vector<8x8xf32> -> vector<8x8xf32>
    %cst_175 = arith.constant dense<0xFF800000> : vector<8xf32>
    %375 = vector.multi_reduction <maximumf>, %374, %cst_175 [1] : vector<8x8xf32> to vector<8xf32>
    %376 = vector.shape_cast %375 : vector<8xf32> to vector<8x1xf32>
    %377 = vector.broadcast %376 : vector<8x1xf32> to vector<8x8xf32>
    %378 = arith.subf %374, %377 : vector<8x8xf32>
    %379 = math.exp %378 : vector<8x8xf32>
    %cst_176 = arith.constant dense<0.000000e+00> : vector<8xf32>
    %380 = vector.multi_reduction <add>, %379, %cst_176 [1] : vector<8x8xf32> to vector<8xf32>
    %381 = vector.shape_cast %380 : vector<8xf32> to vector<8x1xf32>
    %382 = tpu.reciprocal %381 {approx = true} : vector<8x1xf32> -> vector<8x1xf32>
    %383 = vector.broadcast %382 : vector<8x1xf32> to vector<8x8xf32>
    %384 = arith.mulf %379, %383 : vector<8x8xf32>
    %cst_177 = arith.constant dense<0.000000e+00> : vector<8x16xf32>
    %385 = tpu.matmul %384, %373, %cst_177 {dimension_numbers = #tpu.dot_dimension_numbers<[1], [0], [0], [1], [0, 0, 1, 1], [], []>} : vector<8x8xf32>, vector<8x16xf32>, vector<8x16xf32> -> vector<8x16xf32>
    %c112_178 = arith.constant 112 : index
    %c0_179 = arith.constant 0 : index
    %386 = vector.load %arg4[%c112_178, %c0_179] : memref<128x128xf32, #tpu.memory_space<vmem>>, vector<16x128xf32>
    %cst_180 = arith.constant dense<0.000000e+00> : vector<8x128xf32>
    %387 = tpu.matmul %385, %386, %cst_180 {dimension_numbers = #tpu.dot_dimension_numbers<[1], [0], [0], [1], [0, 0, 1, 1], [], []>} : vector<8x16xf32>, vector<16x128xf32>, vector<8x128xf32> -> vector<8x128xf32>
    %388 = arith.addf %370, %387 : vector<8x128xf32>
    %c0_181 = arith.constant 0 : index
    %c0_182 = arith.constant 0 : index
    %389 = vector.load %arg5[%c0_181, %c0_182] : memref<1x128xf32, #tpu.memory_space<vmem>>, vector<1x128xf32>
    %390 = vector.broadcast %389 : vector<1x128xf32> to vector<8x128xf32>
    %391 = arith.addf %388, %390 : vector<8x128xf32>
    %c8_183 = arith.constant 8 : index
    %c0_184 = arith.constant 0 : index
    %392 = vector.load %arg11[%c8_183, %c0_184] : memref<16x128xf32, #tpu.memory_space<vmem>>, vector<8x128xf32>
    %393 = arith.mulf %392, %391 : vector<8x128xf32>
    %394 = vector.extract_strided_slice %393 {offsets = [0, 0], sizes = [1, 128], strides = [1, 1]} : vector<8x128xf32> to vector<1x128xf32>
    %c1_185 = arith.constant 1 : index
    %c0_186 = arith.constant 0 : index
    %395 = vector.load %arg12[%c1_185, %c0_186] : memref<16x128xf32, #tpu.memory_space<vmem>>, vector<1x128xf32>
    tpu.vector_store %arg12[%c1_185, %c0_186], %394 {strides = array<i32>} : memref<16x128xf32, #tpu.memory_space<vmem>>, vector<1x128xf32>,
    %396 = vector.extract_strided_slice %393 {offsets = [1, 0], sizes = [1, 128], strides = [1, 1]} : vector<8x128xf32> to vector<1x128xf32>
    %c3_187 = arith.constant 3 : index
    %c0_188 = arith.constant 0 : index
    %397 = vector.load %arg12[%c3_187, %c0_188] : memref<16x128xf32, #tpu.memory_space<vmem>>, vector<1x128xf32>
    tpu.vector_store %arg12[%c3_187, %c0_188], %396 {strides = array<i32>} : memref<16x128xf32, #tpu.memory_space<vmem>>, vector<1x128xf32>,
    %398 = vector.extract_strided_slice %393 {offsets = [2, 0], sizes = [1, 128], strides = [1, 1]} : vector<8x128xf32> to vector<1x128xf32>
    %c5_189 = arith.constant 5 : index
    %c0_190 = arith.constant 0 : index
    %399 = vector.load %arg12[%c5_189, %c0_190] : memref<16x128xf32, #tpu.memory_space<vmem>>, vector<1x128xf32>
    tpu.vector_store %arg12[%c5_189, %c0_190], %398 {strides = array<i32>} : memref<16x128xf32, #tpu.memory_space<vmem>>, vector<1x128xf32>,
    %400 = vector.extract_strided_slice %393 {offsets = [3, 0], sizes = [1, 128], strides = [1, 1]} : vector<8x128xf32> to vector<1x128xf32>
    %c7_191 = arith.constant 7 : index
    %c0_192 = arith.constant 0 : index
    %401 = vector.load %arg12[%c7_191, %c0_192] : memref<16x128xf32, #tpu.memory_space<vmem>>, vector<1x128xf32>
    tpu.vector_store %arg12[%c7_191, %c0_192], %400 {strides = array<i32>} : memref<16x128xf32, #tpu.memory_space<vmem>>, vector<1x128xf32>,
    %402 = vector.extract_strided_slice %393 {offsets = [4, 0], sizes = [1, 128], strides = [1, 1]} : vector<8x128xf32> to vector<1x128xf32>
    %c9_193 = arith.constant 9 : index
    %c0_194 = arith.constant 0 : index
    %403 = vector.load %arg12[%c9_193, %c0_194] : memref<16x128xf32, #tpu.memory_space<vmem>>, vector<1x128xf32>
    tpu.vector_store %arg12[%c9_193, %c0_194], %402 {strides = array<i32>} : memref<16x128xf32, #tpu.memory_space<vmem>>, vector<1x128xf32>,
    %404 = vector.extract_strided_slice %393 {offsets = [5, 0], sizes = [1, 128], strides = [1, 1]} : vector<8x128xf32> to vector<1x128xf32>
    %c11_195 = arith.constant 11 : index
    %c0_196 = arith.constant 0 : index
    %405 = vector.load %arg12[%c11_195, %c0_196] : memref<16x128xf32, #tpu.memory_space<vmem>>, vector<1x128xf32>
    tpu.vector_store %arg12[%c11_195, %c0_196], %404 {strides = array<i32>} : memref<16x128xf32, #tpu.memory_space<vmem>>, vector<1x128xf32>,
    %406 = vector.extract_strided_slice %393 {offsets = [6, 0], sizes = [1, 128], strides = [1, 1]} : vector<8x128xf32> to vector<1x128xf32>
    %c13_197 = arith.constant 13 : index
    %c0_198 = arith.constant 0 : index
    %407 = vector.load %arg12[%c13_197, %c0_198] : memref<16x128xf32, #tpu.memory_space<vmem>>, vector<1x128xf32>
    tpu.vector_store %arg12[%c13_197, %c0_198], %406 {strides = array<i32>} : memref<16x128xf32, #tpu.memory_space<vmem>>, vector<1x128xf32>,
    %408 = vector.extract_strided_slice %393 {offsets = [7, 0], sizes = [1, 128], strides = [1, 1]} : vector<8x128xf32> to vector<1x128xf32>
    %c15_199 = arith.constant 15 : index
    %c0_200 = arith.constant 0 : index
    %409 = vector.load %arg12[%c15_199, %c0_200] : memref<16x128xf32, #tpu.memory_space<vmem>>, vector<1x128xf32>
    tpu.vector_store %arg12[%c15_199, %c0_200], %408 {strides = array<i32>} : memref<16x128xf32, #tpu.memory_space<vmem>>, vector<1x128xf32>,
    %c0_201 = arith.constant 0 : index
    %c0_202 = arith.constant 0 : index
    %410 = vector.load %arg12[%c0_201, %c0_202] : memref<16x128xf32, #tpu.memory_space<vmem>>, vector<16x128xf32>
    %411 = vector.shape_cast %410 : vector<16x128xf32> to vector<2x8x128xf32>
    %cst_203 = arith.constant dense<0xFF800000> : vector<2x128xf32>
    %412 = vector.multi_reduction <maximumf>, %411, %cst_203 [1] : vector<2x8x128xf32> to vector<2x128xf32>
    %c0_204 = arith.constant 0 : index
    %c0_205 = arith.constant 0 : index
    %413 = vector.load %arg6[%c0_204, %c0_205] : memref<128x128xf32, #tpu.memory_space<vmem>>, vector<128x128xf32>
    %cst_206 = arith.constant dense<0.000000e+00> : vector<2x128xf32>
    %414 = tpu.matmul %412, %413, %cst_206 {dimension_numbers = #tpu.dot_dimension_numbers<[1], [0], [0], [1], [0, 0, 1, 1], [], []>} : vector<2x128xf32>, vector<128x128xf32>, vector<2x128xf32> -> vector<2x128xf32>
    %c0_207 = arith.constant 0 : index
    %c0_208 = arith.constant 0 : index
    %415 = vector.load %arg7[%c0_207, %c0_208] : memref<1x128xf32, #tpu.memory_space<vmem>>, vector<1x128xf32>
    %416 = vector.broadcast %415 : vector<1x128xf32> to vector<2x128xf32>
    %417 = arith.addf %414, %416 : vector<2x128xf32>
    %418 = math.tanh %417 : vector<2x128xf32>
    %c0_209 = arith.constant 0 : index
    %c0_210 = arith.constant 0 : index
    %419 = vector.load %arg8[%c0_209, %c0_210] : memref<128x2xf32, #tpu.memory_space<vmem>>, vector<128x2xf32>
    %cst_211 = arith.constant dense<0.000000e+00> : vector<2x2xf32>
    %420 = tpu.matmul %418, %419, %cst_211 {dimension_numbers = #tpu.dot_dimension_numbers<[1], [0], [0], [1], [0, 0, 1, 1], [], []>} : vector<2x128xf32>, vector<128x2xf32>, vector<2x2xf32> -> vector<2x2xf32>
    %c0_212 = arith.constant 0 : index
    %c0_213 = arith.constant 0 : index
    %421 = vector.load %arg9[%c0_212, %c0_213] : memref<1x2xf32, #tpu.memory_space<vmem>>, vector<1x2xf32>
    %422 = vector.broadcast %421 : vector<1x2xf32> to vector<2x2xf32>
    %423 = arith.addf %420, %422 : vector<2x2xf32>
    %c0_214 = arith.constant 0 : index
    %c0_215 = arith.constant 0 : index
    %424 = vector.load %arg10[%c0_214, %c0_215] : memref<2x2xf32, #tpu.memory_space<vmem>>, vector<2x2xf32>
    tpu.vector_store %arg10[%c0_214, %c0_215], %423 {strides = array<i32>} : memref<2x2xf32, #tpu.memory_space<vmem>>, vector<2x2xf32>,
    return
  }
}

</mosaic_0001>

<bundles_post_ra>
// kernel: tpu_custom_call.1
= control target key start
LH: loop header
LB: loop body
LE: loop exit
PB: predicated region body
PF: predicated region fallthrough
CT: control target
= control target key end

     0   :  { %15 = vsyncpa [#allocation7], 0  ;;  %s6152_s0 = inlined_call_operand.vmem [shape: s32[16], index: 0, kind: input, shape index: {}]   ;;  %s6153_s1 = inlined_call_operand.hbm [shape: f32[64,128], index: 1, kind: input, shape index: {}]   ;;  %s6154_s2 = inlined_call_operand.hbm [shape: f32[128,384], index: 2, kind: input, shape index: {}]   ;;  %s6155_s3 = inlined_call_operand.vmem [shape: f32[1,384], index: 3, kind: input, shape index: {}]   ;;  %s6156_s4 = inlined_call_operand.vmem [shape: f32[128,128], index: 4, kind: input, shape index: {}]   ;;  %s6157_s5 = inlined_call_operand.vmem [shape: f32[1,128], index: 5, kind: input, shape index: {}]   ;;  %s6158_s6 = inlined_call_operand.hbm [shape: f32[128,128], index: 6, kind: input, shape index: {}]   ;;  %s6159_s7 = inlined_call_operand.vmem [shape: f32[1,128], index: 7, kind: input, shape index: {}]   ;;  %s6160_s8 = inlined_call_operand.vmem [shape: f32[128,2], index: 8, kind: input, shape index: {}]   ;;  %s6161_s9 = inlined_call_operand.vmem [shape: f32[1,2], index: 9, kind: input, shape index: {}]   ;;  %s6162_s10 = inlined_call_operand.hbm [shape: f32[2,2], index: 10, kind: output, shape index: {}]  }
   0x1   :  { %16 = vsyncpa [#allocation5], 0 }
   0x2   :  { %17 = vsyncpa [#allocation10], 0 }
   0x3   :  { %18 = vsyncpa [#allocation6], 0  ;;  %s5473_s13 = smov [#allocation9]   ;;  %s25_s17 = sshll.u32 %s6152_s0, 4  ;;  %s26_s17 = int_to_ptr.vmem [resolvable:$true] %s25_s17 }
   0x4   :  { %s46_s14 = sshll.u32 %s5473_s13, 4  ;;  %s5365_s20 = scalar_lea.hbm %s6154_s2, 6144  ;;  %s47_s14 = int_to_ptr.vmem [resolvable:$true] %s46_s14 }
   0x5   :  { %p5366_p0 = scmp.ne.s32.totalorder %s6154_s2, %s5365_s20  ;;  %p5369_p1 = scmp.lt.u32.totalorder %s5365_s20, %s6154_s2 }
   0x7   :  { %p5371_p2 = pnand %p5369_p1, %p5366_p0 }
   0x9   :  { %5374 = shalt.err (!%p5371_p2)
}
   0xa   :  { %s5375_s25 = scalar_lea.vmem %s47_s14, 6144  ;;  %p5380_p4 = scmp.lt.s32.totalorder %s47_s14, %s47_s14 }
   0xb   :  { %p5376_p3 = scmp.ne.s32.totalorder %s47_s14, %s5375_s25  ;;  %p5381_p5 = scmp.lt.s32.totalorder %s5375_s25, %s5375_s25 }
   0xd   :  { %p5382_p6 = por %p5381_p5, %p5380_p4 }
   0xf   :  { %p5383_p7 = pnand %p5382_p6, %p5376_p3 }
  0x11   :  { %5386 = shalt.err (!%p5383_p7)
}
  0x12   :  { %s5474_s0 = smov 384   ;;  %s5475_s26 = smov 24  }
  0x13   :  { %52 = dma.hbm_to_vmem [thread:$0]  %s6154_s2, 6144, %s47_s14, [#allocation10], %s5474_s0, %s5474_s0, %s5475_s26  }
  0x14   :  { %s5387_s29 = scalar_lea.vmem %s26_s17, 16  ;;  %p5392_p9 = scmp.lt.s32.totalorder %s26_s17, %s26_s17 }
  0x15   :  { %p5388_p8 = scmp.ne.s32.totalorder %s26_s17, %s5387_s29  ;;  %p5393_p10 = scmp.lt.s32.totalorder %s5387_s29, %s5387_s29 }
  0x17   :  { %p5394_p11 = por %p5393_p10, %p5392_p9 }
  0x19   :  { %p5395_p12 = pnand %p5394_p11, %p5388_p8 }
  0x1b   :  { %5398 = shalt.err (!%p5395_p12)
}
  0x1c   :  { %s5476_s30 = smov [#allocation4]   ;;  %s5477_s11 = smov [#allocation8]  }
  0x1d   :  { %28 = dma.vmem_to_smem %s26_s17, 16, %s5476_s30, [#allocation7]  }
  0x1e   :  { %s34_s12 = sshll.u32 %s5477_s11, 4  ;;  %s5399_s16 = scalar_lea.hbm %s6153_s1, 1024  ;;  %s35_s12 = int_to_ptr.vmem [resolvable:$true] %s34_s12 }
  0x1f   :  { %p5400_p13 = scmp.ne.s32.totalorder %s6153_s1, %s5399_s16  ;;  %p5403_p0 = scmp.lt.u32.totalorder %s5399_s16, %s6153_s1 }
  0x21   :  { %p5405_p1 = pnand %p5403_p0, %p5400_p13 }
  0x23   :  { %5408 = shalt.err (!%p5405_p1)
}
  0x24   :  { %s5409_s20 = scalar_lea.vmem %s35_s12, 1024  ;;  %p5414_p3 = scmp.lt.s32.totalorder %s35_s12, %s35_s12 }
  0x25   :  { %p5410_p2 = scmp.ne.s32.totalorder %s35_s12, %s5409_s20  ;;  %p5415_p4 = scmp.lt.s32.totalorder %s5409_s20, %s5409_s20 }
  0x27   :  { %p5416_p5 = por %p5415_p4, %p5414_p3 }
  0x29   :  { %p5417_p6 = pnand %p5416_p5, %p5410_p2 }
  0x2b   :  { %5420 = shalt.err (!%p5417_p6)
}
  0x2c   :  { %s5478_s17 = smov 128   ;;  %s5479_s21 = smov 8  }
  0x2d   :  { %40 = dma.hbm_to_vmem [thread:$0]  %s6153_s1, 1024, %s35_s12, [#allocation5], %s5478_s17, %s5478_s17, %s5479_s21  }
  0x2e   :  { %s5480_s24 = smov [#allocation11]   ;;  %s5421_s27 = scalar_lea.hbm %s6158_s6, 2048 }
  0x2f   :  { %s64_s25 = sshll.u32 %s5480_s24, 4  ;;  %p5422_p7 = scmp.ne.s32.totalorder %s6158_s6, %s5421_s27  ;;  %s65_s25 = int_to_ptr.vmem [resolvable:$true] %s64_s25 }
  0x30   :  { %p5425_p8 = scmp.lt.u32.totalorder %s5421_s27, %s6158_s6 }
  0x32   :  { %p5427_p9 = pnand %p5425_p8, %p5422_p7 }
  0x34   :  { %5430 = shalt.err (!%p5427_p9)
}
  0x35   :  { %s5431_s13 = scalar_lea.vmem %s65_s25, 2048  ;;  %p5436_p11 = scmp.lt.s32.totalorder %s65_s25, %s65_s25 }
  0x36   :  { %p5432_p10 = scmp.ne.s32.totalorder %s65_s25, %s5431_s13  ;;  %p5437_p12 = scmp.lt.s32.totalorder %s5431_s13, %s5431_s13 }
  0x38   :  { %p5438_p13 = por %p5437_p12, %p5436_p11 }
  0x3a   :  { %p5439_p0 = pnand %p5438_p13, %p5432_p10 }
  0x3c   :  { %5442 = shalt.err (!%p5439_p0)
}
  0x3d   :  { %70 = dma.hbm_to_vmem [thread:$0]  %s6158_s6, 2048, %s65_s25, [#allocation10], %s5478_s17, %s5478_s17, %s5479_s21  }
  0x3e   :  { %5465 = dma.done.wait [#allocation7], 16  }
  0x3f   :  { %5466 = vsyncadd [#allocation7], 4294967280 }
  0x40   :  { %5467 = dma.done.wait [#allocation5], 1024  }
  0x41   :  { %5468 = vsyncadd [#allocation5], 4294966272 }
  0x42   :  { %5469 = dma.done.wait [#allocation10], 8192  }
  0x43   :  { %5470 = vsyncadd [#allocation10], 4294959104 }
  0x44   :  { %89 = sfence }
  0x45   :  { %v157_v0 = vld [vmem:[#allocation9 + $0x8] sm:$0xff]  ;;  %v160_v1 = vld [vmem:[#allocation9 + $0x20] sm:$0xff]  ;;  %s5586_s15 = sld [smem:[#allocation4]]  ;;  %v159_v4 = vld [vmem:[#allocation9 + $0x18] sm:$0xff]  ;;  %v5481_v7 = vmov 0.0   ;;  %s5589_s6 = sld [smem:[#allocation4 + $0x2]] }
  0x46   :  { %v156_v2 = vld [vmem:[#allocation9] sm:$0xff]  ;;  %v5120_v3 = vpack.c.bf16 %v160_v1, %v157_v0  ;;  %v163_v5 = vld [vmem:[#allocation9 + $0x38] sm:$0xff]  ;;  %v166_v6 = vld [vmem:[#allocation9 + $0x50] sm:$0xff]  ;;  %285 = vmatprep.mubr.f32.mxu0 %v5481_v7  ;;  %s5591_s16 = sld [smem:[#allocation4 + $0x4]]  ;;  %s5593_s18 = sld [smem:[#allocation4 + $0x6]]  ;;  %vm5482_vm0 = vmmov 0  }
  0x47   :  { %v5122_v8 = vpack.c.bf16 %v159_v4, %v156_v2  ;;  %v5124_v9 = vpack.c.bf16 %v166_v6, %v163_v5  ;;  %v162_v10 = vld [vmem:[#allocation9 + $0x30] sm:$0xff]  ;;  %v165_v11 = vld [vmem:[#allocation9 + $0x48] sm:$0xff]  ;;  %v172_v13 = vld [vmem:[#allocation9 + $0x80] sm:$0xff]  ;;  %s5595_s19 = sld [smem:[#allocation4 + $0x8]]  ;;  %s5597_s2 = sld [smem:[#allocation4 + $0xa]]  ;;  %vm373_vm1 = vcmask 130048  }
  0x48   :  { %v169_v12 = vld [vmem:[#allocation9 + $0x68] sm:$0xff]  ;;  %5121 = vmatprep.subr.bf16.mxu0 %v5120_v3  ;;  %v5126_v14 = vpack.c.bf16 %v165_v11, %v162_v10  ;;  %v168_v16 = vld [vmem:[#allocation9 + $0x60] sm:$0xff]  ;;  %v171_v17 = vld [vmem:[#allocation9 + $0x78] sm:$0xff]  ;;  %s5599_s14 = sld [smem:[#allocation4 + $0xc]]  ;;  %s5601_s20 = sld [smem:[#allocation4 + $0xe]]  ;;  %vm450_vm2 = vcmask 64512  }
  0x49   :  { %5123 = vmatpush1.bf16.msra.mxu0 %v5122_v8  ;;  %v5128_v15 = vpack.c.bf16 %v172_v13, %v169_v12  ;;  %v175_v18 = vld [vmem:[#allocation9 + $0x98] sm:$0xff]  ;;  %v178_v19 = vld [vmem:[#allocation9 + $0xb0] sm:$0xff]  ;;  %v5130_v20 = vpack.c.bf16 %v171_v17, %v168_v16  ;;  %v177_v23 = vld [vmem:[#allocation9 + $0xa8] sm:$0xff]  ;;  %s4496_s27 = sld [smem:[#allocation4 + $0x1]]  ;;  %s4498_s28 = sld [smem:[#allocation4 + $0x3]]  ;;  %vm4294_vm3 = vcmask 1041409  }
  0x4a   :  { %5125 = vmatprep.subr.bf16.mxu0 %v5124_v9  ;;  %v5132_v21 = vpack.c.bf16 %v178_v19, %v175_v18  ;;  %v174_v22 = vld [vmem:[#allocation9 + $0x90] sm:$0xff]  ;;  %v181_v24 = vld [vmem:[#allocation9 + $0xc8] sm:$0xff]  ;;  %v184_v25 = vld [vmem:[#allocation9 + $0xe0] sm:$0xff]  ;;  %s4500_s29 = sld [smem:[#allocation4 + $0x5]]  ;;  %s4502_s30 = sld [smem:[#allocation4 + $0x7]]  ;;  %vm4461_vm4 = vcmask 9216  }
  0x4b   :  { %s91_s17 = scalar_lea.vmem [#allocation8], %s5586_s15  ;;  %v180_v27 = vld [vmem:[#allocation9 + $0xc0] sm:$0xff]  ;;  %v183_v28 = vld [vmem:[#allocation9 + $0xd8] sm:$0xff]  ;;  %s99_s21 = scalar_lea.vmem [#allocation8], %s5589_s6  ;;  %v5134_v32 = vpack.c.bf16 %v177_v23, %v174_v22  ;;  %v190_v34 = vld [vmem:[#allocation9 + $0x110] sm:$0xff]  ;;  %v5136_v38 = vpack.c.bf16 %v184_v25, %v181_v24 }
  0x4c   :  { %v92_v26 = vld [vmem:[%s91_s17] sm:$0x1]  ;;  %s107_s22 = scalar_lea.vmem [#allocation8], %s5591_s16  ;;  %s115_s23 = scalar_lea.vmem [#allocation8], %s5593_s18  ;;  %v187_v33 = vld [vmem:[#allocation9 + $0xf8] sm:$0xff]  ;;  %v158_v36 = vld [vmem:[#allocation9 + $0x10] sm:$0xff]  ;;  %v5138_v48 = vpack.c.bf16 %v183_v28, %v180_v27  ;;  %v206_v28 = vlaneseq }
  0x4d   :  { %5127 = vmatpush1.bf16.msra.mxu0 %v5126_v14  ;;  %93 = vst [vmem:[#allocation2] sm:$0x1] %v92_v26  ;;  %v100_v29 = vld [vmem:[%s99_s21] sm:$0x1]  ;;  %s123_s24 = scalar_lea.vmem [#allocation8], %s5595_s19  ;;  %v161_v37 = vld [vmem:[#allocation9 + $0x28] sm:$0xff]  ;;  %v5140_v49 = vpack.c.bf16 %v190_v34, %v187_v33 }
  0x4e   :  { %5129 = vmatprep.subr.bf16.mxu0 %v5128_v15  ;;  %v108_v30 = vld [vmem:[%s107_s22] sm:$0x1]  ;;  %101 = vst [vmem:[#allocation2 + $0x1] sm:$0x1] %v100_v29  ;;  %s131_s25 = scalar_lea.vmem [#allocation8], %s5597_s2  ;;  %s139_s0 = scalar_lea.vmem [#allocation8], %s5599_s14  ;;  %v5152_v41 = vpack.c.bf16 %v161_v37, %v158_v36 }
  0x4f   :  { %v116_v31 = vld [vmem:[%s115_s23] sm:$0x1]  ;;  %109 = vst [vmem:[#allocation2 + $0x2] sm:$0x1] %v108_v30  ;;  %s147_s26 = scalar_lea.vmem [#allocation8], %s5601_s20  ;;  %v167_v44 = vld [vmem:[#allocation9 + $0x58] sm:$0xff] }
  0x50   :  { %117 = vst [vmem:[#allocation2 + $0x3] sm:$0x1] %v116_v31  ;;  %v124_v35 = vld [vmem:[%s123_s24] sm:$0x1]  ;;  %v170_v45 = vld [vmem:[#allocation9 + $0x70] sm:$0xff]  ;;  %5153 = vmatprep.subr.bf16.mxu1 %v5152_v41  ;;  %v173_v47 = vld [vmem:[#allocation9 + $0x88] sm:$0xff] }
  0x51   :  { %5131 = vmatpush1.bf16.msra.mxu0 %v5130_v20  ;;  %125 = vst [vmem:[#allocation2 + $0x4] sm:$0x1] %v124_v35  ;;  %v132_v39 = vld [vmem:[%s131_s25] sm:$0x1]  ;;  %5155 = vmatpush3.bf16.msra.mxu1 %v5152_v41  ;;  %v186_v50 = vld [vmem:[#allocation9 + $0xf0] sm:$0xff]  ;;  %v189_v51 = vld [vmem:[#allocation9 + $0x108] sm:$0xff]  ;;  %v5160_v53 = vpack.c.bf16 %v173_v47, %v170_v45 }
  0x52   :  { %5133 = vmatprep.subr.bf16.mxu0 %v5132_v21  ;;  %v140_v40 = vld [vmem:[%s139_s0] sm:$0x1]  ;;  %133 = vst [vmem:[#allocation2 + $0x5] sm:$0x1] %v132_v39  ;;  %v193_v52 = vld [vmem:[#allocation9 + $0x128] sm:$0xff]  ;;  %v179_v56 = vld [vmem:[#allocation9 + $0xb8] sm:$0xff]  ;;  %v5142_v57 = vpack.c.bf16 %v189_v51, %v186_v50 }
  0x53   :  { %v164_v42 = vld [vmem:[#allocation9 + $0x40] sm:$0xff]  ;;  %141 = vst [vmem:[#allocation2 + $0x6] sm:$0x1] %v140_v40  ;;  %v195_v60 = vld [vmem:[#allocation9 + $0x138] sm:$0xff]  ;;  %v202_v62 = vld [vmem:[#allocation9 + $0x170] sm:$0xff]  ;;  %s4504_s11 = sld [smem:[#allocation4 + $0x9]] }
  0x54   :  { %v148_v43 = vld [vmem:[%s147_s26] sm:$0x1]  ;;  %v5156_v46 = vpack.c.bf16 %v167_v44, %v164_v42  ;;  %v199_v61 = vld [vmem:[#allocation9 + $0x158] sm:$0xff]  ;;  %v182_v1 = vld [vmem:[#allocation9 + $0xd0] sm:$0xff]  ;;  %s4506_s13 = sld [smem:[#allocation4 + $0xb]]  ;;  %s4508_s1 = sld [smem:[#allocation4 + $0xd]] }
  0x55   :  { %149 = vst [vmem:[#allocation2 + $0x7] sm:$0x1] %v148_v43  ;;  %5135 = vmatpush1.bf16.msra.mxu0 %v5134_v32  ;;  %v196_v54 = vld [vmem:[#allocation9 + $0x140] sm:$0xff]  ;;  %v185_v2 = vld [vmem:[#allocation9 + $0xe8] sm:$0xff]  ;;  %v5148_v4 = vpack.c.bf16 %v202_v62, %v199_v61  ;;  %v198_v5 = vld [vmem:[#allocation9 + $0x150] sm:$0xff]  ;;  %s4510_s12 = sld [smem:[#allocation4 + $0xf]] }
  0x56   :  { %5137 = vmatprep.subr.bf16.mxu0 %v5136_v38  ;;  %5157 = vmatprep.subr.bf16.mxu1 %v5156_v46  ;;  %v176_v55 = vld [vmem:[#allocation9 + $0xa0] sm:$0xff]  ;;  %v5144_v59 = vpack.c.bf16 %v196_v54, %v193_v52  ;;  %v201_v6 = vld [vmem:[#allocation9 + $0x168] sm:$0xff]  ;;  %v5168_v8 = vpack.c.bf16 %v185_v2, %v182_v1  ;;  %v191_v10 = vld [vmem:[#allocation9 + $0x118] sm:$0xff]  ;;  %s95_s15 = scalar_lea.vmem [#allocation8], %s4496_s27  ;;  %s103_s6 = scalar_lea.vmem [#allocation8], %s4498_s28  ;;  %v207_v29 = vshrl.u32 %v206_v28, 7 }
  0x57   :  { %v192_v58 = vld [vmem:[#allocation9 + $0x120] sm:$0xff]  ;;  %5159 = vmatpush3.bf16.msra.mxu1 %v5156_v46  ;;  %v5164_v63 = vpack.c.bf16 %v179_v56, %v176_v55  ;;  %v5150_v11 = vpack.c.bf16 %v201_v6, %v198_v5  ;;  %v194_v13 = vld [vmem:[#allocation9 + $0x130] sm:$0xff]  ;;  %v197_v14 = vld [vmem:[#allocation9 + $0x148] sm:$0xff]  ;;  %s111_s16 = scalar_lea.vmem [#allocation8], %s4500_s29  ;;  %s119_s18 = scalar_lea.vmem [#allocation8], %s4502_s30  ;;  %v5486_v2 = vmov 0.0|0.0  }
  0x58   :  { %5161 = vmatprep.subr.bf16.mxu1 %v5160_v53  ;;  %v5146_v3 = vpack.c.bf16 %v195_v60, %v192_v58  ;;  %v188_v9 = vld [vmem:[#allocation9 + $0x100] sm:$0xff]  ;;  %v5176_v15 = vpack.c.bf16 %v197_v14, %v194_v13  ;;  %v203_v17 = vld [vmem:[#allocation9 + $0x178] sm:$0xff]  ;;  %v212_v30 = vsub.s32 1, %v207_v29  ;;  %v208_v32 = vsub.s32 0, %v207_v29  ;;  %s5483_s22 = smov 112   ;;  %s5485_s23 = smov 80  }
  0x59   :  { %5139 = vmatpush1.bf16.msra.mxu0 %v5138_v48  ;;  %v5172_v12 = vpack.c.bf16 %v191_v10, %v188_v9  ;;  %v200_v16 = vld [vmem:[#allocation9 + $0x160] sm:$0xff]  ;;  %s127_s19 = scalar_lea.vmem [#allocation8], %s4504_s11  ;;  %v216_v39 = vsub.s32 2, %v207_v29  ;;  %v703_v6 = vld [vmem:[%s6156_s4 + $0x10] sm:$0xff]  ;;  %v536_v13 = vld [vmem:[%s6156_s4 + $0x8] sm:$0xff]  ;;  %s5487_s11 = smov 64  }
  0x5a   :  { %5141 = vmatprep.subr.bf16.mxu0 %v5140_v49  ;;  %v5180_v18 = vpack.c.bf16 %v203_v17, %v200_v16  ;;  %v96_v19 = vld [vmem:[%s95_s15] sm:$0x1]  ;;  %s135_s2 = scalar_lea.vmem [#allocation8], %s4506_s13  ;;  %s143_s14 = scalar_lea.vmem [#allocation8], %s4508_s1 }
  0x5b   :  { %5163 = vmatpush3.bf16.msra.mxu1 %v5160_v53  ;;  %v104_v20 = vld [vmem:[%s103_s6] sm:$0x1]  ;;  %97 = vst [vmem:[#allocation2 + $0x8] sm:$0x1] %v96_v19  ;;  %s151_s20 = scalar_lea.vmem [#allocation8], %s4510_s12  ;;  %s5488_s6 = smov 48  }
  0x5c   :  { %v5611_v0 = vld [vmem:[#allocation2] sm:$0xff]  ;;  %5165 = vmatprep.subr.bf16.mxu1 %v5164_v63  ;;  %105 = vst [vmem:[#allocation2 + $0x9] sm:$0x1] %v104_v20  ;;  %s5490_s25 = smov 16  }
  0x5d   :  { %4775 = vmatprep.mubr.f32.mxu1 %v5611_v0  ;;  %5143 = vmatpush1.bf16.msra.mxu0 %v5142_v57  ;;  %v112_v21 = vld [vmem:[%s111_s16] sm:$0x1] }
  0x5e   :  { %5145 = vmatprep.subr.bf16.mxu0 %v5144_v59  ;;  %v120_v22 = vld [vmem:[%s119_s18] sm:$0x1]  ;;  %113 = vst [vmem:[#allocation2 + $0xa] sm:$0x1] %v112_v21 }
  0x5f   :  { %5167 = vmatpush3.bf16.msra.mxu1 %v5164_v63  ;;  %121 = vst [vmem:[#allocation2 + $0xb] sm:$0x1] %v120_v22  ;;  %v128_v23 = vld [vmem:[%s127_s19] sm:$0x1] }
  0x60   :  { %5169 = vmatprep.subr.bf16.mxu1 %v5168_v8  ;;  %v136_v24 = vld [vmem:[%s135_s2] sm:$0x1]  ;;  %129 = vst [vmem:[#allocation2 + $0xc] sm:$0x1] %v128_v23 }
  0x61   :  { %5147 = vmatpush1.bf16.msra.mxu0 %v5146_v3  ;;  %137 = vst [vmem:[#allocation2 + $0xd] sm:$0x1] %v136_v24  ;;  %v144_v25 = vld [vmem:[%s143_s14] sm:$0x1]  ;;  %s5489_s14 = smov 32  }
  0x62   :  { %5149 = vmatprep.subr.bf16.mxu0 %v5148_v4  ;;  %v152_v26 = vld [vmem:[%s151_s20] sm:$0x1]  ;;  %145 = vst [vmem:[#allocation2 + $0xe] sm:$0x1] %v144_v25 }
  0x63   :  { %5171 = vmatpush3.bf16.msra.mxu1 %v5168_v8  ;;  %153 = vst [vmem:[#allocation2 + $0xf] sm:$0x1] %v152_v26  ;;  %v204_v31 = vld [vmem:[%s6155_s3] sm:$0x7]  ;;  %s5484_s3 = smov 96   ;;  %v704_v8 = vld [vmem:[%s6156_s4 + $0x18] sm:$0xff] }
  0x64   :  { %5173 = vmatprep.subr.bf16.mxu1 %v5172_v12  ;;  %v5625_v33 = vrot.slane %v204_v31, %v212_v30  ;;  %v5627_v35 = vrot.slane %v204_v31, %v208_v32  ;;  %v217_v40 = vrot.slane %v204_v31, %v216_v39  ;;  %v5684_v9 = vpack.c.bf16 %v704_v8, %v703_v6 }
  0x65   :  { %5151 = vmatpush1.bf16.msra.mxu0 %v5150_v11 }
  0x66   :  { %4783 = vmatprep.subr.mxu0 %v5481_v7 }
  0x67   :  { %5175 = vmatpush3.bf16.msra.mxu1 %v5172_v12  ;;  %v535_v12 = vld [vmem:[%s6156_s4] sm:$0xff] }
  0x68   :  { %286 = vmatmul.mubr.f32.vlgmr.msra.gmra.mrb[0].mxu0 %v5611_v0  ;;  %5177 = vmatprep.subr.bf16.mxu1 %v5176_v15 }
  0x69   :  { %291 = vmatprep.mubr.f32.mxu0 %v5481_v7 }
  0x6a   :  { %v155_v27 = vld [vmem:[#allocation2 + $0x8] sm:$0xff] }
  0x6b   :  { %5179 = vmatpush3.bf16.msra.mxu1 %v5176_v15  ;;  %v5695_v15 = vpack.c.bf16 %v536_v13, %v535_v12 }
  0x6c   :  { %5181 = vmatprep.subr.bf16.mxu1 %v5180_v18  ;;  %292 = vmatmul.mubr.f32.gmra.mrb[2].mxu0 %v155_v27 }
  0x6d   :  { %4785 = vmatprep.mubr.msk.f32.mxu0 %vm5482_vm0, %v5481_v7 }
  0x6f   :  { %5183 = vmatpush3.bf16.msra.mxu1 %v5180_v18 }
  0x70   :  { %4778 = vmatprep.subr.mxu1 %v5481_v7 }
  0x72   :  { %4776 = vmatmul.mubr.f32.vlgmr.msra.gmra.mrb[0].mxu1 %v155_v27 }
  0x73   :  { %4780 = vmatprep.mubr.msk.f32.mxu1 %vm5482_vm0, %v5481_v7 }
 0x13b   :  { %v287_v34 = vpop.f32.mrb[0].mxu0 }
 0x13c   :  { %v289_v36 = vpop.f32.mrb[1].mxu0  ;;  %v5637_v38 = vadd.f32 %v287_v34, %v5627_v35 }
 0x13d   :  { %v5630_v37 = vadd.f32 %v289_v36, %v5625_v33 }
 0x13f   :  { %539 = vrot.lane.b32.xlu0 %v5630_v37, %s5483_s22  ;;  %4779 = vmatpush3.xpose.msk.msra.mxu1 %vm373_vm1, %v5630_v37  ;;  %v5670_v1 = vpop.f32.mrb[2].mxu0 }
 0x140   :  { %4788 = vmatprep.subr.mxu1 %v5481_v7  ;;  %v5673_v3 = vpop.f32.mrb[3].mxu0 }
 0x142   :  { %4781 = vmatmul.mubr.msk.f32.vlgmr.msra.gmra.mrb[2].mxu1 %vm373_vm1, %v5637_v38 }
 0x143   :  { %537 = vrot.lane.b32.xlu0 %v5637_v38, %s5483_s22  ;;  %4790 = vmatprep.mubr.msk.f32.mxu1 %vm5482_vm0, %v5481_v7 }
 0x145   :  { %v4777_v41 = vpop.f32.mrb[0].mxu1 }
 0x146   :  { %v5646_v42 = vadd.f32 %v4777_v41, %v217_v40  ;;  %v364_v43 = vpop.f32.mrb[1].mxu1  ;;  %v1016_v41 = vld [vmem:[%s6156_s4 + $0x20] sm:$0xff] }
 0x147   :  { %v5648_v44 = vadd.f32 %v364_v43, %v217_v40  ;;  %v1017_v43 = vld [vmem:[%s6156_s4 + $0x28] sm:$0xff] }
 0x149   :  { %4784 = vmatpush3.msra.mxu0 %v5648_v44 }
 0x14a   :  { %4793 = vmatprep.subr.mxu0 %v5481_v7 }
 0x1b1   :  { %v540_v45 = vpop.permute.xlu0 %539 }
 0x1b2   :  { %4789 = vmatpush3.xpose.msk.msra.mxu1 %vm373_vm1, %v540_v45  ;;  %v5728_v45 = vpack.c.bf16 %v1017_v43, %v1016_v41 }
 0x1b3   :  { %5184 = vmatprep.subr.bf16.mxu1 %v5486_v2 }
 0x1b5   :  { %v538_v46 = vpop.permute.xlu0 %537 }
 0x1b6   :  { %4791 = vmatmul.mubr.msk.f32.vlgmr.msra.gmra.mrb[4].mxu1 %vm373_vm1, %v538_v46 }
 0x1b7   :  { %4802 = vmatprep.mubr.msk.f32.mxu1 %vm5482_vm0, %v5481_v7  ;;  %5186 = vmatpush3.bf16.msra.mxu1 %v5684_v9 }
 0x1b8   :  { %4812 = vmatprep.subr.mxu1 %v5481_v7 }
 0x215   :  { %v446_v47 = vpop.f32.mrb[2].mxu1 }
 0x216   :  { %v4782_v48 = vpop.f32.mrb[3].mxu1  ;;  %v451_v49 = vsel %vm450_vm2, %v446_v47, -inf }
 0x217   :  { %452 = vmax.xlane.f32.xlu1 %v451_v49 }
 0x289   :  { %v611_v50 = vpop.f32.mrb[4].mxu1 }
 0x28a   :  { %v4792_v51 = vpop.f32.mrb[5].mxu1  ;;  %v615_v52 = vsel %vm450_vm2, %v611_v50, -inf }
 0x28b   :  { %616 = vmax.xlane.f32.xlu1 %v615_v52 }
 0x2a4   :  { %v453_v53 = vpop.xlane.xlu1 %452 }
 0x2a5   :  { %v454_v54 = vsub.f32 %v446_v47, %v453_v53 }
 0x2a7   :  { %v455_v55 = vmul.f32 1.442695, %v454_v54 }
 0x2a9   :  { %5299 = vpow2.f32 %v455_v55 }
 0x2b3   :  { %v5300_v56 = vpop.eup %5299 }
 0x2b4   :  { %v457_v57 = vsel %vm450_vm2, %v5300_v56, 0.0 }
 0x2b5   :  { %458 = vadd.xlane.f32.xlu0 %v457_v57 }
 0x2cb   :  { %940 = vrot.lane.b32.xlu0 %v5648_v44, %s5484_s3 }
 0x2cf   :  { %1094 = vrot.lane.b32.xlu0 %v5630_v37, %s5485_s23 }
 0x318   :  { %v617_v58 = vpop.xlane.xlu1 %616 }
 0x319   :  { %v618_v59 = vsub.f32 %v611_v50, %v617_v58 }
 0x31b   :  { %v619_v60 = vmul.f32 1.442695, %v618_v59 }
 0x31d   :  { %5301 = vpow2.f32 %v619_v60 }
 0x327   :  { %v5302_v61 = vpop.eup %5301 }
 0x328   :  { %v621_v62 = vsel %vm450_vm2, %v5302_v61, 0.0 }
 0x329   :  { %622 = vadd.xlane.f32.xlu1 %v621_v62  ;;  %v1257_v62 = vld [vmem:[%s6156_s4 + $0x30] sm:$0xff] }
 0x33a   :  { %627 = vrot.lane.b32.xlu1 %v5648_v44, %s5483_s22 }
 0x33e   :  { %853 = vrot.lane.b32.xlu1 %v5630_v37, %s5484_s3 }
 0x342   :  { %v459_v63 = vpop.xlane.xlu0 %458  ;;  %851 = vrot.lane.b32.xlu1 %v5637_v38, %s5484_s3 }
 0x343   :  { %5303 = vrcp.f32 %v459_v63  ;;  %v1258_v63 = vld [vmem:[%s6156_s4 + $0x38] sm:$0xff] }
 0x346   :  { %v941_v18 = vpop.permute.xlu0 %940 }
 0x34a   :  { %v1095_v46 = vpop.permute.xlu0 %1094 }
 0x34d   :  { %v5304_v4 = vpop.eup %5303 }
 0x34e   :  { %v461_v5 = vmul.f32 %v5304_v4, %v5300_v56  ;;  %v5758_v4 = vpack.c.bf16 %v1258_v63, %v1257_v62 }
 0x350   :  { %4786 = vmatmul.mubr.msk.f32.vlgmr.msra.gmra.mrb[4].mxu0 %vm450_vm2, %v461_v5 }
 0x351   :  { %4795 = vmatprep.mubr.msk.f32.mxu0 %vm5482_vm0, %v5481_v7 }
 0x3b6   :  { %v623_v10 = vpop.xlane.xlu1 %622 }
 0x3b7   :  { %5305 = vrcp.f32 %v623_v10 }
 0x3ba   :  { %v628_v11 = vpop.permute.xlu1 %627 }
 0x3bb   :  { %4794 = vmatpush3.msra.mxu0 %v628_v11 }
 0x3bc   :  { %5187 = vmatprep.subr.bf16.mxu0 %v5486_v2 }
 0x3be   :  { %v854_v20 = vpop.permute.xlu1 %853 }
 0x3c1   :  { %v5306_v14 = vpop.eup %5305 }
 0x3c2   :  { %v625_v16 = vmul.f32 %v5306_v14, %v5302_v61  ;;  %v852_v23 = vpop.permute.xlu1 %851 }
 0x3c4   :  { %4796 = vmatmul.mubr.msk.f32.vlgmr.msra.gmra.mrb[6].mxu0 %vm450_vm2, %v625_v16 }
 0x3c5   :  { %5189 = vmatpush3.bf16.msra.mxu0 %v5695_v15  ;;  %4809 = vmatprep.mubr.msk.f32.mxu0 %vm5482_vm0, %v5481_v7 }
 0x3c6   :  { %4817 = vmatprep.subr.mxu0 %v5481_v7 }
 0x423   :  { %v531_v17 = vpop.f32.mrb[4].mxu0 }
 0x424   :  { %v4787_v19 = vpop.f32.mrb[5].mxu0  ;;  %4810 = vmatmul.mubr.msk.f32.vlgmr.msra.gmra.mrb[8].mxu0 %vm373_vm1, %v531_v17 }
 0x425   :  { %4818 = vmatpush3.msra.mxu0 %v941_v18  ;;  %4819 = vmatprep.mubr.msk.f32.mxu0 %vm5482_vm0, %v5481_v7 }
 0x426   :  { %4829 = vmatprep.subr.mxu0 %v5481_v7 }
 0x497   :  { %v699_v21 = vpop.f32.mrb[6].mxu0 }
 0x498   :  { %v4797_v22 = vpop.f32.mrb[7].mxu0  ;;  %4803 = vmatmul.mubr.msk.f32.vlgmr.msra.gmra.mrb[6].mxu1 %vm373_vm1, %v699_v21 }
 0x499   :  { %4813 = vmatpush3.xpose.msk.msra.mxu1 %vm373_vm1, %v854_v20  ;;  %4814 = vmatprep.mubr.msk.f32.mxu1 %vm5482_vm0, %v5481_v7 }
 0x49a   :  { %5190 = vmatprep.subr.bf16.mxu1 %v5486_v2 }
 0x49c   :  { %4815 = vmatmul.mubr.msk.f32.vlgmr.msra.gmra.mrb[8].mxu1 %vm373_vm1, %v852_v23 }
 0x49d   :  { %4826 = vmatprep.mubr.msk.f32.mxu1 %vm5482_vm0, %v5481_v7  ;;  %5192 = vmatpush3.bf16.msra.mxu1 %v5728_v45 }
 0x49e   :  { %4834 = vmatprep.subr.mxu1 %v5481_v7 }
 0x4f7   :  { %v847_v24 = vpop.f32.mrb[8].mxu0 }
 0x4f8   :  { %v4811_v25 = vpop.f32.mrb[9].mxu0 }
 0x56b   :  { %v774_v26 = vpop.f32.mrb[6].mxu1 }
 0x56c   :  { %v848_v27 = vadd.f32 %v847_v24, %v774_v26  ;;  %v4804_v28 = vpop.f32.mrb[7].mxu1 }
 0x56d   :  { %v1499_v28 = vld [vmem:[%s6156_s4 + $0x48] sm:$0xff] }
 0x56f   :  { %v925_v29 = vpop.f32.mrb[8].mxu1 }
 0x570   :  { %v4816_v30 = vpop.f32.mrb[9].mxu1  ;;  %v929_v31 = vsel %vm450_vm2, %v925_v29, -inf }
 0x571   :  { %930 = vmax.xlane.f32.xlu1 %v929_v31 }
 0x582   :  { %1181 = vrot.lane.b32.xlu1 %v5648_v44, %s5485_s23 }
 0x586   :  { %1335 = vrot.lane.b32.xlu1 %v5630_v37, %s5487_s11 }
 0x5fe   :  { %v931_v32 = vpop.xlane.xlu1 %930 }
 0x5ff   :  { %v932_v34 = vsub.f32 %v925_v29, %v931_v32 }
 0x601   :  { %v933_v36 = vmul.f32 1.442695, %v932_v34 }
 0x602   :  { %v1182_v52 = vpop.permute.xlu1 %1181 }
 0x603   :  { %5307 = vpow2.f32 %v933_v36 }
 0x606   :  { %v1336_v10 = vpop.permute.xlu1 %1335 }
 0x60d   :  { %v5308_v39 = vpop.eup %5307 }
 0x60e   :  { %v935_v40 = vsel %vm450_vm2, %v5308_v39, 0.0 }
 0x60f   :  { %936 = vadd.xlane.f32.xlu0 %v935_v40 }
 0x625   :  { %1092 = vrot.lane.b32.xlu0 %v5637_v38, %s5485_s23 }
 0x69c   :  { %v937_v47 = vpop.xlane.xlu0 %936 }
 0x69d   :  { %5309 = vrcp.f32 %v937_v47 }
 0x6a0   :  { %v1093_v50 = vpop.permute.xlu0 %1092 }
 0x6a7   :  { %v5310_v48 = vpop.eup %5309 }
 0x6a8   :  { %v939_v49 = vmul.f32 %v5310_v48, %v5308_v39 }
 0x6aa   :  { %4820 = vmatmul.mubr.msk.f32.vlgmr.msra.gmra.mrb[10].mxu0 %vm450_vm2, %v939_v49 }
 0x6ab   :  { %4830 = vmatpush3.xpose.msk.msra.mxu0 %vm373_vm1, %v1095_v46  ;;  %4831 = vmatprep.mubr.msk.f32.mxu0 %vm5482_vm0, %v5481_v7 }
 0x6ac   :  { %5193 = vmatprep.subr.bf16.mxu0 %v5486_v2 }
 0x6ae   :  { %4832 = vmatmul.mubr.msk.f32.vlgmr.msra.gmra.mrb[12].mxu0 %vm373_vm1, %v1093_v50 }
 0x6af   :  { %4843 = vmatprep.mubr.msk.f32.mxu0 %vm5482_vm0, %v5481_v7  ;;  %5195 = vmatpush3.bf16.msra.mxu0 %v5758_v4 }
 0x6b0   :  { %4851 = vmatprep.subr.mxu0 %v5481_v7 }
 0x77d   :  { %v1012_v51 = vpop.f32.mrb[10].mxu0 }
 0x77e   :  { %v4821_v53 = vpop.f32.mrb[11].mxu0  ;;  %4827 = vmatmul.mubr.msk.f32.vlgmr.msra.gmra.mrb[10].mxu1 %vm373_vm1, %v1012_v51 }
 0x77f   :  { %4835 = vmatpush3.msra.mxu1 %v1182_v52  ;;  %4836 = vmatprep.mubr.msk.f32.mxu1 %vm5482_vm0, %v5481_v7 }
 0x780   :  { %4846 = vmatprep.subr.mxu1 %v5481_v7 }
 0x781   :  { %v1166_v54 = vpop.f32.mrb[12].mxu0 }
 0x782   :  { %v4833_v55 = vpop.f32.mrb[13].mxu0  ;;  %v1170_v56 = vsel %vm450_vm2, %v1166_v54, -inf }
 0x783   :  { %1171 = vmax.xlane.f32.xlu0 %v1170_v56  ;;  %v1739_v56 = vld [vmem:[%s6156_s4 + $0x50] sm:$0xff] }
 0x799   :  { %1422 = vrot.lane.b32.xlu0 %v5648_v44, %s5487_s11 }
 0x79d   :  { %1576 = vrot.lane.b32.xlu0 %v5630_v37, %s5488_s6 }
 0x810   :  { %v1172_v57 = vpop.xlane.xlu0 %1171 }
 0x811   :  { %v1173_v58 = vsub.f32 %v1166_v54, %v1172_v57  ;;  %v1740_v57 = vld [vmem:[%s6156_s4 + $0x58] sm:$0xff] }
 0x813   :  { %v1174_v59 = vmul.f32 1.442695, %v1173_v58 }
 0x814   :  { %v1423_v17 = vpop.permute.xlu0 %1422 }
 0x815   :  { %5311 = vpow2.f32 %v1174_v59 }
 0x818   :  { %v1577_v34 = vpop.permute.xlu0 %1576 }
 0x81f   :  { %v5312_v60 = vpop.eup %5311 }
 0x820   :  { %v1176_v61 = vsel %vm450_vm2, %v5312_v60, 0.0 }
 0x821   :  { %1177 = vadd.xlane.f32.xlu1 %v1176_v61 }
 0x832   :  { %1333 = vrot.lane.b32.xlu1 %v5637_v38, %s5487_s11 }
 0x851   :  { %v1087_v5 = vpop.f32.mrb[10].mxu1 }
 0x852   :  { %v1091_v6 = vadd.f32 %v1087_v5, %v848_v27  ;;  %v4828_v8 = vpop.f32.mrb[11].mxu1  ;;  %v1498_v27 = vld [vmem:[%s6156_s4 + $0x40] sm:$0xff] }
 0x853   :  { %v5788_v29 = vpack.c.bf16 %v1499_v28, %v1498_v27 }
 0x8ae   :  { %v1178_v11 = vpop.xlane.xlu1 %1177 }
 0x8af   :  { %5313 = vrcp.f32 %v1178_v11 }
 0x8b2   :  { %v1334_v14 = vpop.permute.xlu1 %1333 }
 0x8b9   :  { %v5314_v12 = vpop.eup %5313 }
 0x8ba   :  { %v1180_v13 = vmul.f32 %v5314_v12, %v5312_v60 }
 0x8bc   :  { %4837 = vmatmul.mubr.msk.f32.vlgmr.msra.gmra.mrb[12].mxu1 %vm450_vm2, %v1180_v13 }
 0x8bd   :  { %4847 = vmatpush3.xpose.msk.msra.mxu1 %vm373_vm1, %v1336_v10  ;;  %4848 = vmatprep.mubr.msk.f32.mxu1 %vm5482_vm0, %v5481_v7 }
 0x8be   :  { %5196 = vmatprep.subr.bf16.mxu1 %v5486_v2 }
 0x8c0   :  { %4849 = vmatmul.mubr.msk.f32.vlgmr.msra.gmra.mrb[14].mxu1 %vm373_vm1, %v1334_v14 }
 0x8c1   :  { %4860 = vmatprep.mubr.msk.f32.mxu1 %vm5482_vm0, %v5481_v7  ;;  %5198 = vmatpush3.bf16.msra.mxu1 %v5788_v29 }
 0x8c2   :  { %4868 = vmatprep.subr.mxu1 %v5481_v7 }
 0x98f   :  { %v1253_v16 = vpop.f32.mrb[12].mxu1 }
 0x990   :  { %v4838_v18 = vpop.f32.mrb[13].mxu1  ;;  %4844 = vmatmul.mubr.msk.f32.vlgmr.msra.gmra.mrb[14].mxu0 %vm373_vm1, %v1253_v16  ;;  %v5839_v16 = vadd.f32 %v5673_v3, %v5625_v33  ;;  %v1981_v33 = vld [vmem:[%s6156_s4 + $0x68] sm:$0xff] }
 0x991   :  { %4852 = vmatpush3.msra.mxu0 %v1423_v17  ;;  %4853 = vmatprep.mubr.msk.f32.mxu0 %vm5482_vm0, %v5481_v7 }
 0x992   :  { %4863 = vmatprep.subr.mxu0 %v5481_v7 }
 0x993   :  { %v1407_v19 = vpop.f32.mrb[14].mxu1 }
 0x994   :  { %v4850_v20 = vpop.f32.mrb[15].mxu1  ;;  %v1411_v21 = vsel %vm450_vm2, %v1407_v19, -inf }
 0x995   :  { %1412 = vmax.xlane.f32.xlu1 %v1411_v21 }
 0x9a6   :  { %1663 = vrot.lane.b32.xlu1 %v5648_v44, %s5488_s6 }
 0x9aa   :  { %1817 = vrot.lane.b32.xlu1 %v5630_v37, %s5489_s14 }
 0xa22   :  { %v1413_v22 = vpop.xlane.xlu1 %1412 }
 0xa23   :  { %v1414_v23 = vsub.f32 %v1407_v19, %v1413_v22 }
 0xa25   :  { %v1415_v24 = vmul.f32 1.442695, %v1414_v23 }
 0xa26   :  { %v1664_v46 = vpop.permute.xlu1 %1663 }
 0xa27   :  { %5315 = vpow2.f32 %v1415_v24 }
 0xa2a   :  { %v1818_v61 = vpop.permute.xlu1 %1817 }
 0xa31   :  { %v5316_v25 = vpop.eup %5315 }
 0xa32   :  { %v1417_v26 = vsel %vm450_vm2, %v5316_v25, 0.0 }
 0xa33   :  { %1418 = vadd.xlane.f32.xlu0 %v1417_v26 }
 0xa49   :  { %1574 = vrot.lane.b32.xlu0 %v5637_v38, %s5488_s6 }
 0xa63   :  { %v1328_v30 = vpop.f32.mrb[14].mxu0 }
 0xa64   :  { %v1332_v31 = vadd.f32 %v1328_v30, %v1091_v6  ;;  %v4845_v32 = vpop.f32.mrb[15].mxu0 }
 0xac0   :  { %v1419_v36 = vpop.xlane.xlu0 %1418 }
 0xac1   :  { %5317 = vrcp.f32 %v1419_v36 }
 0xac4   :  { %v1575_v41 = vpop.permute.xlu0 %1574 }
 0xacb   :  { %v5318_v39 = vpop.eup %5317 }
 0xacc   :  { %v1421_v40 = vmul.f32 %v5318_v39, %v5316_v25 }
 0xace   :  { %4854 = vmatmul.mubr.msk.f32.vlgmr.msra.gmra.mrb[16].mxu0 %vm450_vm2, %v1421_v40 }
 0xacf   :  { %4864 = vmatpush3.xpose.msk.msra.mxu0 %vm373_vm1, %v1577_v34  ;;  %4865 = vmatprep.mubr.msk.f32.mxu0 %vm5482_vm0, %v5481_v7 }
 0xad0   :  { %5199 = vmatprep.subr.bf16.mxu0 %v5486_v2 }
 0xad2   :  { %4866 = vmatmul.mubr.msk.f32.vlgmr.msra.gmra.mrb[18].mxu0 %vm373_vm1, %v1575_v41 }
 0xad3   :  { %4877 = vmatprep.mubr.msk.f32.mxu0 %vm5482_vm0, %v5481_v7 }
 0xba1   :  { %v1494_v43 = vpop.f32.mrb[16].mxu0 }
 0xba2   :  { %v4855_v47 = vpop.f32.mrb[17].mxu0  ;;  %4861 = vmatmul.mubr.msk.f32.vlgmr.msra.gmra.mrb[16].mxu1 %vm373_vm1, %v1494_v43 }
 0xba3   :  { %4869 = vmatpush3.msra.mxu1 %v1664_v46  ;;  %4870 = vmatprep.mubr.msk.f32.mxu1 %vm5482_vm0, %v5481_v7 }
 0xba4   :  { %4880 = vmatprep.subr.mxu1 %v5481_v7 }
 0xba5   :  { %v1648_v48 = vpop.f32.mrb[18].mxu0 }
 0xba6   :  { %v4867_v49 = vpop.f32.mrb[19].mxu0  ;;  %v1652_v50 = vsel %vm450_vm2, %v1648_v48, -inf }
 0xba7   :  { %1653 = vmax.xlane.f32.xlu0 %v1652_v50  ;;  %v2221_v49 = vld [vmem:[%s6156_s4 + $0x70] sm:$0xff]  ;;  %v2222_v50 = vld [vmem:[%s6156_s4 + $0x78] sm:$0xff] }
 0xbbd   :  { %1904 = vrot.lane.b32.xlu0 %v5648_v44, %s5489_s14 }
 0xbc1   :  { %2058 = vrot.lane.b32.xlu0 %v5630_v37, %s5490_s25  ;;  %v5818_v37 = vpack.c.bf16 %v1740_v57, %v1739_v56 }
 0xbc3   :  { %5201 = vmatpush3.bf16.msra.mxu0 %v5818_v37 }
 0xbc4   :  { %4885 = vmatprep.subr.mxu0 %v5481_v7 }
 0xc34   :  { %v1654_v51 = vpop.xlane.xlu0 %1653 }
 0xc35   :  { %v1655_v52 = vsub.f32 %v1648_v48, %v1654_v51  ;;  %v5872_v48 = vadd.f32 %v5670_v1, %v5627_v35  ;;  %v5882_v51 = vpack.c.bf16 %v2222_v50, %v2221_v49 }
 0xc37   :  { %v1656_v53 = vmul.f32 1.442695, %v1655_v52 }
 0xc38   :  { %v1905_v10 = vpop.permute.xlu0 %1904 }
 0xc39   :  { %5319 = vpow2.f32 %v1656_v53 }
 0xc3c   :  { %v2059_v25 = vpop.permute.xlu0 %2058 }
 0xc43   :  { %v5320_v54 = vpop.eup %5319 }
 0xc44   :  { %v1658_v55 = vsel %vm450_vm2, %v5320_v54, 0.0 }
 0xc45   :  { %1659 = vadd.xlane.f32.xlu1 %v1658_v55 }
 0xc56   :  { %1815 = vrot.lane.b32.xlu1 %v5637_v38, %s5489_s14 }
 0xc75   :  { %v1569_v58 = vpop.f32.mrb[16].mxu1 }
 0xc76   :  { %v1573_v59 = vadd.f32 %v1569_v58, %v1332_v31  ;;  %v4862_v60 = vpop.f32.mrb[17].mxu1 }
 0xcd2   :  { %v1660_v62 = vpop.xlane.xlu1 %1659 }
 0xcd3   :  { %5321 = vrcp.f32 %v1660_v62 }
 0xcd6   :  { %v1816_v6 = vpop.permute.xlu1 %1815 }
 0xcdd   :  { %v5322_v63 = vpop.eup %5321 }
 0xcde   :  { %v1662_v5 = vmul.f32 %v5322_v63, %v5320_v54 }
 0xce0   :  { %4871 = vmatmul.mubr.msk.f32.vlgmr.msra.gmra.mrb[18].mxu1 %vm450_vm2, %v1662_v5 }
 0xce1   :  { %4881 = vmatpush3.xpose.msk.msra.mxu1 %vm373_vm1, %v1818_v61  ;;  %4882 = vmatprep.mubr.msk.f32.mxu1 %vm5482_vm0, %v5481_v7 }
 0xce2   :  { %5202 = vmatprep.subr.bf16.mxu1 %v5486_v2 }
 0xce4   :  { %4883 = vmatmul.mubr.msk.f32.vlgmr.msra.gmra.mrb[20].mxu1 %vm373_vm1, %v1816_v6 }
 0xce5   :  { %4894 = vmatprep.mubr.msk.f32.mxu1 %vm5482_vm0, %v5481_v7 }
 0xdb3   :  { %v1735_v8 = vpop.f32.mrb[18].mxu1 }
 0xdb4   :  { %v4872_v11 = vpop.f32.mrb[19].mxu1  ;;  %4878 = vmatmul.mubr.msk.f32.vlgmr.msra.gmra.mrb[20].mxu0 %vm373_vm1, %v1735_v8 }
 0xdb5   :  { %4886 = vmatpush3.msra.mxu0 %v1905_v10  ;;  %4887 = vmatprep.mubr.msk.f32.mxu0 %vm5482_vm0, %v5481_v7 }
 0xdb6   :  { %4897 = vmatprep.subr.mxu0 %v5481_v7 }
 0xdb7   :  { %v1889_v12 = vpop.f32.mrb[20].mxu1 }
 0xdb8   :  { %v4884_v13 = vpop.f32.mrb[21].mxu1  ;;  %v1893_v14 = vsel %vm450_vm2, %v1889_v12, -inf }
 0xdb9   :  { %1894 = vmax.xlane.f32.xlu1 %v1893_v14 }
 0xdca   :  { %2145 = vrot.lane.b32.xlu1 %v5648_v44, %s5490_s25  ;;  %v1980_v44 = vld [vmem:[%s6156_s4 + $0x60] sm:$0xff] }
 0xdcb   :  { %v5852_v3 = vpack.c.bf16 %v1981_v33, %v1980_v44 }
 0xdcd   :  { %5204 = vmatpush3.bf16.msra.mxu1 %v5852_v3 }
 0xdce   :  { %2479 = vrot.lane.b32.xlu1 %v5839_v16, %s5483_s22  ;;  %4902 = vmatprep.subr.mxu1 %v5481_v7 }
 0xe46   :  { %v1895_v17 = vpop.xlane.xlu1 %1894 }
 0xe47   :  { %v1896_v18 = vsub.f32 %v1889_v12, %v1895_v17 }
 0xe49   :  { %v1897_v19 = vmul.f32 1.442695, %v1896_v18 }
 0xe4a   :  { %v2146_v31 = vpop.permute.xlu1 %2145 }
 0xe4b   :  { %5323 = vpow2.f32 %v1897_v19 }
 0xe4e   :  { %v2480_v53 = vpop.permute.xlu1 %2479 }
 0xe55   :  { %v5324_v20 = vpop.eup %5323 }
 0xe56   :  { %v1899_v21 = vsel %vm450_vm2, %v5324_v20, 0.0 }
 0xe57   :  { %1900 = vadd.xlane.f32.xlu0 %v1899_v21  ;;  %v5921_v21 = vld [vmem:[%s6157_s5] ss:$0 sm:$0xff] }
 0xe6d   :  { %2056 = vrot.lane.b32.xlu0 %v5637_v38, %s5490_s25 }
 0xe87   :  { %v1810_v22 = vpop.f32.mrb[20].mxu0 }
 0xe88   :  { %v1814_v23 = vadd.f32 %v1810_v22, %v1573_v59  ;;  %v4879_v24 = vpop.f32.mrb[21].mxu0 }
 0xee4   :  { %v1901_v26 = vpop.xlane.xlu0 %1900 }
 0xee5   :  { %5325 = vrcp.f32 %v1901_v26 }
 0xee8   :  { %v2057_v28 = vpop.permute.xlu0 %2056 }
 0xeef   :  { %v5326_v38 = vpop.eup %5325 }
 0xef0   :  { %v1903_v27 = vmul.f32 %v5326_v38, %v5324_v20 }
 0xef2   :  { %4888 = vmatmul.mubr.msk.f32.vlgmr.msra.gmra.mrb[22].mxu0 %vm450_vm2, %v1903_v27 }
 0xef3   :  { %4898 = vmatpush3.xpose.msk.msra.mxu0 %vm373_vm1, %v2059_v25  ;;  %4899 = vmatprep.mubr.msk.f32.mxu0 %vm5482_vm0, %v5481_v7 }
 0xef4   :  { %5205 = vmatprep.subr.bf16.mxu0 %v5486_v2 }
 0xef6   :  { %4900 = vmatmul.mubr.msk.f32.vlgmr.msra.gmra.mrb[24].mxu0 %vm373_vm1, %v2057_v28 }
 0xef7   :  { %4911 = vmatprep.mubr.msk.f32.mxu0 %vm5482_vm0, %v5481_v7  ;;  %5207 = vmatpush3.bf16.msra.mxu0 %v5882_v51 }
 0xef8   :  { %4919 = vmatprep.subr.mxu0 %v5481_v7 }
 0xfc5   :  { %v1976_v30 = vpop.f32.mrb[22].mxu0 }
 0xfc6   :  { %v4889_v32 = vpop.f32.mrb[23].mxu0  ;;  %4895 = vmatmul.mubr.msk.f32.vlgmr.msra.gmra.mrb[22].mxu1 %vm373_vm1, %v1976_v30 }
 0xfc7   :  { %4903 = vmatpush3.msra.mxu1 %v2146_v31  ;;  %4904 = vmatprep.mubr.msk.f32.mxu1 %vm5482_vm0, %v5481_v7 }
 0xfc8   :  { %4914 = vmatprep.subr.mxu1 %v5481_v7 }
 0xfc9   :  { %v2130_v34 = vpop.f32.mrb[24].mxu0 }
 0xfca   :  { %v4901_v36 = vpop.f32.mrb[25].mxu0  ;;  %v2134_v39 = vsel %vm450_vm2, %v2130_v34, -inf }
 0xfcb   :  { %2135 = vmax.xlane.f32.xlu0 %v2134_v39 }
0x1058   :  { %v2136_v40 = vpop.xlane.xlu0 %2135 }
0x1059   :  { %v2137_v41 = vsub.f32 %v2130_v34, %v2136_v40 }
0x105b   :  { %v2138_v43 = vmul.f32 1.442695, %v2137_v41 }
0x105d   :  { %5327 = vpow2.f32 %v2138_v43 }
0x1067   :  { %v5328_v46 = vpop.eup %5327 }
0x1068   :  { %v2140_v47 = vsel %vm450_vm2, %v5328_v46, 0.0 }
0x1069   :  { %2141 = vadd.xlane.f32.xlu1 %v2140_v47 }
0x107a   :  { %2477 = vrot.lane.b32.xlu1 %v5872_v48, %s5483_s22 }
0x1099   :  { %v2051_v52 = vpop.f32.mrb[22].mxu1 }
0x109a   :  { %v2055_v35 = vadd.f32 %v2051_v52, %v1814_v23  ;;  %v4896_v1 = vpop.f32.mrb[23].mxu1 }
0x10f6   :  { %v2142_v54 = vpop.xlane.xlu1 %2141 }
0x10f7   :  { %5329 = vrcp.f32 %v2142_v54 }
0x10fa   :  { %v2478_v57 = vpop.permute.xlu1 %2477 }
0x1101   :  { %v5330_v55 = vpop.eup %5329 }
0x1102   :  { %v2144_v56 = vmul.f32 %v5330_v55, %v5328_v46 }
0x1104   :  { %4905 = vmatmul.mubr.msk.f32.vlgmr.msra.gmra.mrb[24].mxu1 %vm450_vm2, %v2144_v56 }
0x1105   :  { %4915 = vmatpush3.xpose.msk.msra.mxu1 %vm373_vm1, %v5839_v16  ;;  %4916 = vmatprep.mubr.msk.f32.mxu1 %vm5482_vm0, %v5481_v7 }
0x1106   :  { %4924 = vmatprep.subr.mxu1 %v5481_v7 }
0x1108   :  { %4917 = vmatmul.mubr.msk.f32.vlgmr.msra.gmra.mrb[26].mxu1 %vm373_vm1, %v5872_v48 }
0x1109   :  { %4925 = vmatpush3.xpose.msk.msra.mxu1 %vm373_vm1, %v2480_v53  ;;  %4926 = vmatprep.mubr.msk.f32.mxu1 %vm5482_vm0, %v5481_v7 }
0x110a   :  { %5208 = vmatprep.subr.bf16.mxu1 %v5486_v2 }
0x110c   :  { %4927 = vmatmul.mubr.msk.f32.vlgmr.msra.gmra.mrb[28].mxu1 %vm373_vm1, %v2478_v57 }
0x110d   :  { %5210 = vmatpush3.bf16.msra.mxu1 %v5684_v9  ;;  %4938 = vmatprep.mubr.msk.f32.mxu1 %vm5482_vm0, %v5481_v7 }
0x110e   :  { %4948 = vmatprep.subr.mxu1 %v5481_v7 }
0x11d7   :  { %v2217_v58 = vpop.f32.mrb[24].mxu1 }
0x11d8   :  { %v4906_v59 = vpop.f32.mrb[25].mxu1  ;;  %4912 = vmatmul.mubr.msk.f32.vlgmr.msra.gmra.mrb[26].mxu0 %vm373_vm1, %v2217_v58 }
0x11d9   :  { %4920 = vmatpush3.msra.mxu0 %v5646_v42  ;;  %4921 = vmatprep.mubr.msk.f32.mxu0 %vm5482_vm0, %v5481_v7 }
0x11da   :  { %4929 = vmatprep.subr.mxu0 %v5481_v7 }
0x11db   :  { %v2387_v60 = vpop.f32.mrb[26].mxu1 }
0x11dc   :  { %v4918_v61 = vpop.f32.mrb[27].mxu1  ;;  %v2391_v9 = vsel %vm450_vm2, %v2387_v60, -inf }
0x11dd   :  { %2392 = vmax.xlane.f32.xlu1 %v2391_v9 }
0x11df   :  { %v2551_v62 = vpop.f32.mrb[28].mxu1 }
0x11e0   :  { %v4928_v63 = vpop.f32.mrb[29].mxu1  ;;  %v2555_v5 = vsel %vm450_vm2, %v2551_v62, -inf }
0x11e1   :  { %2556 = vmax.xlane.f32.xlu0 %v2555_v5 }
0x11ee   :  { %2791 = vrot.lane.b32.xlu1 %v5872_v48, %s5484_s3 }
0x126a   :  { %v2393_v6 = vpop.xlane.xlu1 %2392 }
0x126b   :  { %v2394_v8 = vsub.f32 %v2387_v60, %v2393_v6 }
0x126d   :  { %v2395_v10 = vmul.f32 1.442695, %v2394_v8 }
0x126e   :  { %v2557_v11 = vpop.xlane.xlu0 %2556 }
0x126f   :  { %5331 = vpow2.f32 %v2395_v10  ;;  %v2558_v12 = vsub.f32 %v2551_v62, %v2557_v11 }
0x1271   :  { %v2559_v13 = vmul.f32 1.442695, %v2558_v12 }
0x1273   :  { %5333 = vpow2.f32 %v2559_v13 }
0x1279   :  { %v5332_v14 = vpop.eup %5331 }
0x127a   :  { %v2397_v17 = vsel %vm450_vm2, %v5332_v14, 0.0 }
0x127b   :  { %2398 = vadd.xlane.f32.xlu0 %v2397_v17 }
0x127d   :  { %v5334_v18 = vpop.eup %5333 }
0x127e   :  { %v2561_v19 = vsel %vm450_vm2, %v5334_v18, 0.0 }
0x127f   :  { %2562 = vadd.xlane.f32.xlu0 %v2561_v19 }
0x1295   :  { %2567 = vrot.lane.b32.xlu0 %v5646_v42, %s5483_s22 }
0x1299   :  { %2793 = vrot.lane.b32.xlu0 %v5839_v16, %s5484_s3 }
0x12ab   :  { %v2292_v20 = vpop.f32.mrb[26].mxu0 }
0x12ac   :  { %v2296_v44 = vadd.f32 %v2292_v20, %v2055_v35  ;;  %v4913_v33 = vpop.f32.mrb[27].mxu0 }
0x12ae   :  { %v2304_v22 = vadd.f32 %v5921_v21, %v2296_v44 }
0x12b0   :  { %v2306_v23 = vmul.f32 %v2304_v22, %v5611_v0 }
0x12b2   :  { %2307 = vst [vmem:[#allocation3] ss:$8 sps:$4 sm:$0x11] %v2306_v23   ;;  %2308 = vst [vmem:[#allocation3 + $0x1] ss:$8 sps:$4 sm:$0x22] %v2306_v23  }
0x12b3   :  { %2309 = vst [vmem:[#allocation3 + $0x2] ss:$8 sps:$4 sm:$0x44] %v2306_v23   ;;  %2310 = vst [vmem:[#allocation3 + $0x3] ss:$8 sps:$4 sm:$0x88] %v2306_v23  }
0x1308   :  { %v2399_v24 = vpop.xlane.xlu0 %2398 }
0x1309   :  { %5335 = vrcp.f32 %v2399_v24 }
0x130c   :  { %v2563_v25 = vpop.xlane.xlu0 %2562 }
0x130d   :  { %5337 = vrcp.f32 %v2563_v25 }
0x1310   :  { %v2568_v27 = vpop.permute.xlu0 %2567 }
0x1313   :  { %v5336_v26 = vpop.eup %5335 }
0x1314   :  { %v2401_v38 = vmul.f32 %v5336_v26, %v5332_v14  ;;  %v2794_v34 = vpop.permute.xlu0 %2793 }
0x1316   :  { %4922 = vmatmul.mubr.msk.f32.vlgmr.msra.gmra.mrb[28].mxu0 %vm450_vm2, %v2401_v38 }
0x1317   :  { %v5338_v28 = vpop.eup %5337  ;;  %4930 = vmatpush3.msra.mxu0 %v2568_v27  ;;  %4931 = vmatprep.mubr.msk.f32.mxu0 %vm5482_vm0, %v5481_v7 }
0x1318   :  { %v2565_v30 = vmul.f32 %v5338_v28, %v5334_v18  ;;  %5211 = vmatprep.subr.bf16.mxu0 %v5486_v2 }
0x131a   :  { %4932 = vmatmul.mubr.msk.f32.vlgmr.msra.gmra.mrb[30].mxu0 %vm450_vm2, %v2565_v30 }
0x131b   :  { %5213 = vmatpush3.bf16.msra.mxu0 %v5695_v15  ;;  %4945 = vmatprep.mubr.msk.f32.mxu0 %vm5482_vm0, %v5481_v7  ;;  %v2792_v15 = vpop.permute.xlu1 %2791 }
0x131c   :  { %4953 = vmatprep.subr.mxu0 %v5481_v7 }
0x13e9   :  { %v2471_v0 = vpop.f32.mrb[28].mxu0 }
0x13ea   :  { %v4923_v31 = vpop.f32.mrb[29].mxu0  ;;  %4946 = vmatmul.mubr.msk.f32.vlgmr.msra.gmra.mrb[32].mxu0 %vm373_vm1, %v2471_v0 }
0x13eb   :  { %4955 = vmatprep.mubr.msk.f32.mxu0 %vm5482_vm0, %v5481_v7 }
0x13ed   :  { %v2639_v32 = vpop.f32.mrb[30].mxu0 }
0x13ee   :  { %v4933_v36 = vpop.f32.mrb[31].mxu0  ;;  %4939 = vmatmul.mubr.msk.f32.vlgmr.msra.gmra.mrb[30].mxu1 %vm373_vm1, %v2639_v32 }
0x13ef   :  { %4949 = vmatpush3.xpose.msk.msra.mxu1 %vm373_vm1, %v2794_v34  ;;  %4950 = vmatprep.mubr.msk.f32.mxu1 %vm5482_vm0, %v5481_v7 }
0x13f0   :  { %5214 = vmatprep.subr.bf16.mxu1 %v5486_v2 }
0x13f2   :  { %4951 = vmatmul.mubr.msk.f32.vlgmr.msra.gmra.mrb[32].mxu1 %vm373_vm1, %v2792_v15 }
0x13f3   :  { %5216 = vmatpush3.bf16.msra.mxu1 %v5728_v45  ;;  %4962 = vmatprep.mubr.msk.f32.mxu1 %vm5482_vm0, %v5481_v7 }
0x13f4   :  { %4970 = vmatprep.subr.mxu1 %v5481_v7 }
0x14bd   :  { %v2787_v39 = vpop.f32.mrb[32].mxu0 }
0x14be   :  { %v4947_v40 = vpop.f32.mrb[33].mxu0 }
0x14c1   :  { %v2714_v41 = vpop.f32.mrb[30].mxu1 }
0x14c2   :  { %v2788_v43 = vadd.f32 %v2787_v39, %v2714_v41  ;;  %v4940_v46 = vpop.f32.mrb[31].mxu1 }
0x14c5   :  { %v2865_v47 = vpop.f32.mrb[32].mxu1 }
0x14c6   :  { %v4952_v49 = vpop.f32.mrb[33].mxu1  ;;  %v2869_v50 = vsel %vm450_vm2, %v2865_v47, -inf }
0x14c7   :  { %2870 = vmax.xlane.f32.xlu0 %v2869_v50 }
0x14dd   :  { %2880 = vrot.lane.b32.xlu0 %v5646_v42, %s5484_s3 }
0x14e1   :  { %3032 = vrot.lane.b32.xlu0 %v5872_v48, %s5485_s23 }
0x1554   :  { %v2871_v45 = vpop.xlane.xlu0 %2870 }
0x1555   :  { %v2872_v52 = vsub.f32 %v2865_v47, %v2871_v45 }
0x1557   :  { %v2873_v35 = vmul.f32 1.442695, %v2872_v52 }
0x1558   :  { %v2881_v1 = vpop.permute.xlu0 %2880 }
0x1559   :  { %5339 = vpow2.f32 %v2873_v35  ;;  %4954 = vmatpush3.msra.mxu0 %v2881_v1 }
0x155a   :  { %4965 = vmatprep.subr.mxu0 %v5481_v7 }
0x155c   :  { %v3033_v59 = vpop.permute.xlu0 %3032 }
0x1563   :  { %v5340_v53 = vpop.eup %5339 }
0x1564   :  { %v2875_v54 = vsel %vm450_vm2, %v5340_v53, 0.0 }
0x1565   :  { %2876 = vadd.xlane.f32.xlu1 %v2875_v54 }
0x1576   :  { %3034 = vrot.lane.b32.xlu1 %v5839_v16, %s5485_s23 }
0x15f2   :  { %v2877_v55 = vpop.xlane.xlu1 %2876 }
0x15f3   :  { %5341 = vrcp.f32 %v2877_v55 }
0x15f6   :  { %v3035_v58 = vpop.permute.xlu1 %3034 }
0x15fd   :  { %v5342_v56 = vpop.eup %5341 }
0x15fe   :  { %v2879_v57 = vmul.f32 %v5342_v56, %v5340_v53 }
0x1600   :  { %4956 = vmatmul.mubr.msk.f32.vlgmr.msra.gmra.mrb[34].mxu0 %vm450_vm2, %v2879_v57 }
0x1601   :  { %4966 = vmatpush3.xpose.msk.msra.mxu0 %vm373_vm1, %v3035_v58  ;;  %4967 = vmatprep.mubr.msk.f32.mxu0 %vm5482_vm0, %v5481_v7 }
0x1602   :  { %5217 = vmatprep.subr.bf16.mxu0 %v5486_v2 }
0x1604   :  { %4968 = vmatmul.mubr.msk.f32.vlgmr.msra.gmra.mrb[36].mxu0 %vm373_vm1, %v3033_v59 }
0x1605   :  { %5219 = vmatpush3.bf16.msra.mxu0 %v5758_v4  ;;  %4979 = vmatprep.mubr.msk.f32.mxu0 %vm5482_vm0, %v5481_v7 }
0x1606   :  { %4987 = vmatprep.subr.mxu0 %v5481_v7 }
0x16d3   :  { %v2952_v60 = vpop.f32.mrb[34].mxu0 }
0x16d4   :  { %v4957_v61 = vpop.f32.mrb[35].mxu0  ;;  %4963 = vmatmul.mubr.msk.f32.vlgmr.msra.gmra.mrb[34].mxu1 %vm373_vm1, %v2952_v60 }
0x16d5   :  { %4972 = vmatprep.mubr.msk.f32.mxu1 %vm5482_vm0, %v5481_v7 }
0x16d7   :  { %v3106_v9 = vpop.f32.mrb[36].mxu0 }
0x16d8   :  { %v4969_v62 = vpop.f32.mrb[37].mxu0  ;;  %v3110_v63 = vsel %vm450_vm2, %v3106_v9, -inf }
0x16d9   :  { %3111 = vmax.xlane.f32.xlu0 %v3110_v63 }
0x16ef   :  { %3121 = vrot.lane.b32.xlu0 %v5646_v42, %s5485_s23 }
0x16f3   :  { %3273 = vrot.lane.b32.xlu0 %v5872_v48, %s5487_s11 }
0x1766   :  { %v3112_v4 = vpop.xlane.xlu0 %3111 }
0x1767   :  { %v3113_v5 = vsub.f32 %v3106_v9, %v3112_v4 }
0x1769   :  { %v3114_v6 = vmul.f32 1.442695, %v3113_v5 }
0x176a   :  { %v3122_v8 = vpop.permute.xlu0 %3121 }
0x176b   :  { %5343 = vpow2.f32 %v3114_v6  ;;  %4971 = vmatpush3.msra.mxu1 %v3122_v8 }
0x176c   :  { %4982 = vmatprep.subr.mxu1 %v5481_v7 }
0x176e   :  { %v3274_v44 = vpop.permute.xlu0 %3273 }
0x1775   :  { %v5344_v10 = vpop.eup %5343 }
0x1776   :  { %v3116_v11 = vsel %vm450_vm2, %v5344_v10, 0.0 }
0x1777   :  { %3117 = vadd.xlane.f32.xlu1 %v3116_v11 }
0x1788   :  { %3275 = vrot.lane.b32.xlu1 %v5839_v16, %s5487_s11 }
0x17a7   :  { %v3027_v12 = vpop.f32.mrb[34].mxu1 }
0x17a8   :  { %v3031_v13 = vadd.f32 %v3027_v12, %v2788_v43  ;;  %v4964_v14 = vpop.f32.mrb[35].mxu1 }
0x1804   :  { %v3118_v17 = vpop.xlane.xlu1 %3117 }
0x1805   :  { %5345 = vrcp.f32 %v3118_v17 }
0x1808   :  { %v3276_v20 = vpop.permute.xlu1 %3275 }
0x180f   :  { %v5346_v18 = vpop.eup %5345 }
0x1810   :  { %v3120_v19 = vmul.f32 %v5346_v18, %v5344_v10 }
0x1812   :  { %4973 = vmatmul.mubr.msk.f32.vlgmr.msra.gmra.mrb[36].mxu1 %vm450_vm2, %v3120_v19 }
0x1813   :  { %4983 = vmatpush3.xpose.msk.msra.mxu1 %vm373_vm1, %v3276_v20  ;;  %4984 = vmatprep.mubr.msk.f32.mxu1 %vm5482_vm0, %v5481_v7 }
0x1814   :  { %5220 = vmatprep.subr.bf16.mxu1 %v5486_v2 }
0x1816   :  { %4985 = vmatmul.mubr.msk.f32.vlgmr.msra.gmra.mrb[38].mxu1 %vm373_vm1, %v3274_v44 }
0x1817   :  { %5222 = vmatpush3.bf16.msra.mxu1 %v5788_v29  ;;  %4996 = vmatprep.mubr.msk.f32.mxu1 %vm5482_vm0, %v5481_v7 }
0x1818   :  { %5004 = vmatprep.subr.mxu1 %v5481_v7 }
0x18e5   :  { %v3193_v33 = vpop.f32.mrb[36].mxu1 }
0x18e6   :  { %v4974_v22 = vpop.f32.mrb[37].mxu1  ;;  %4980 = vmatmul.mubr.msk.f32.vlgmr.msra.gmra.mrb[38].mxu0 %vm373_vm1, %v3193_v33 }
0x18e7   :  { %4989 = vmatprep.mubr.msk.f32.mxu0 %vm5482_vm0, %v5481_v7 }
0x18e9   :  { %v3347_v23 = vpop.f32.mrb[38].mxu1 }
0x18ea   :  { %v4986_v24 = vpop.f32.mrb[39].mxu1  ;;  %v3351_v25 = vsel %vm450_vm2, %v3347_v23, -inf }
0x18eb   :  { %3352 = vmax.xlane.f32.xlu0 %v3351_v25 }
0x1901   :  { %3362 = vrot.lane.b32.xlu0 %v5646_v42, %s5487_s11 }
0x1905   :  { %3514 = vrot.lane.b32.xlu0 %v5872_v48, %s5488_s6 }
0x1978   :  { %v3353_v29 = vpop.xlane.xlu0 %3352 }
0x1979   :  { %v3354_v26 = vsub.f32 %v3347_v23, %v3353_v29 }
0x197b   :  { %v3355_v38 = vmul.f32 1.442695, %v3354_v26 }
0x197c   :  { %v3363_v27 = vpop.permute.xlu0 %3362 }
0x197d   :  { %5347 = vpow2.f32 %v3355_v38  ;;  %4988 = vmatpush3.msra.mxu0 %v3363_v27 }
0x197e   :  { %4999 = vmatprep.subr.mxu0 %v5481_v7 }
0x1980   :  { %v3515_v40 = vpop.permute.xlu0 %3514 }
0x1987   :  { %v5348_v28 = vpop.eup %5347 }
0x1988   :  { %v3357_v30 = vsel %vm450_vm2, %v5348_v28, 0.0 }
0x1989   :  { %3358 = vadd.xlane.f32.xlu1 %v3357_v30 }
0x199a   :  { %3516 = vrot.lane.b32.xlu1 %v5839_v16, %s5488_s6 }
0x19b9   :  { %v3268_v0 = vpop.f32.mrb[38].mxu0 }
0x19ba   :  { %v3272_v31 = vadd.f32 %v3268_v0, %v3031_v13  ;;  %v4981_v32 = vpop.f32.mrb[39].mxu0 }
0x19bb   :  { %v4269_v32 = vld [vmem:[#allocation11] sm:$0xff] }
0x1a16   :  { %v3359_v34 = vpop.xlane.xlu1 %3358 }
0x1a17   :  { %5349 = vrcp.f32 %v3359_v34  ;;  %v4270_v34 = vld [vmem:[#allocation11 + $0x8] sm:$0xff] }
0x1a1a   :  { %v3517_v39 = vpop.permute.xlu1 %3516 }
0x1a21   :  { %v5350_v36 = vpop.eup %5349 }
0x1a22   :  { %v3361_v15 = vmul.f32 %v5350_v36, %v5348_v28  ;;  %v5233_v36 = vpack.c.bf16 %v4270_v34, %v4269_v32  ;;  %v4379_v32 = vld [vmem:[%s6160_s8 + $0x58] sm:$0xff] }
0x1a24   :  { %4990 = vmatmul.mubr.msk.f32.vlgmr.msra.gmra.mrb[40].mxu0 %vm450_vm2, %v3361_v15 }
0x1a25   :  { %5000 = vmatpush3.xpose.msk.msra.mxu0 %vm373_vm1, %v3517_v39  ;;  %5001 = vmatprep.mubr.msk.f32.mxu0 %vm5482_vm0, %v5481_v7 }
0x1a26   :  { %5223 = vmatprep.subr.bf16.mxu0 %v5486_v2 }
0x1a28   :  { %5002 = vmatmul.mubr.msk.f32.vlgmr.msra.gmra.mrb[42].mxu0 %vm373_vm1, %v3515_v40  ;;  %v4271_v40 = vld [vmem:[#allocation11 + $0x10] sm:$0xff] }
0x1a29   :  { %5225 = vmatpush3.bf16.msra.mxu0 %v5818_v37  ;;  %5013 = vmatprep.mubr.msk.f32.mxu0 %vm5482_vm0, %v5481_v7 }
0x1a2a   :  { %5021 = vmatprep.subr.mxu0 %v5481_v7 }
0x1af7   :  { %v3434_v41 = vpop.f32.mrb[40].mxu0 }
0x1af8   :  { %v4991_v43 = vpop.f32.mrb[41].mxu0  ;;  %4997 = vmatmul.mubr.msk.f32.vlgmr.msra.gmra.mrb[40].mxu1 %vm373_vm1, %v3434_v41  ;;  %v4272_v41 = vld [vmem:[#allocation11 + $0x18] sm:$0xff] }
0x1af9   :  { %5006 = vmatprep.mubr.msk.f32.mxu1 %vm5482_vm0, %v5481_v7  ;;  %v5236_v43 = vpack.c.bf16 %v4272_v41, %v4271_v40  ;;  %v4382_v40 = vld [vmem:[%s6160_s8 + $0x70] sm:$0xff]  ;;  %v4383_v41 = vld [vmem:[%s6160_s8 + $0x78] sm:$0xff] }
0x1afb   :  { %v3588_v46 = vpop.f32.mrb[42].mxu0 }
0x1afc   :  { %v5003_v47 = vpop.f32.mrb[43].mxu0  ;;  %v3592_v49 = vsel %vm450_vm2, %v3588_v46, -inf }
0x1afd   :  { %3593 = vmax.xlane.f32.xlu0 %v3592_v49  ;;  %v4274_v47 = vld [vmem:[#allocation11 + $0x28] sm:$0xff] }
0x1b13   :  { %3603 = vrot.lane.b32.xlu0 %v5646_v42, %s5488_s6 }
0x1b17   :  { %3755 = vrot.lane.b32.xlu0 %v5872_v48, %s5489_s14 }
0x1b8a   :  { %v3594_v37 = vpop.xlane.xlu0 %3593 }
0x1b8b   :  { %v3595_v50 = vsub.f32 %v3588_v46, %v3594_v37  ;;  %v4273_v46 = vld [vmem:[#allocation11 + $0x20] sm:$0xff]  ;;  %v4275_v37 = vld [vmem:[#allocation11 + $0x30] sm:$0xff] }
0x1b8c   :  { %v5239_v49 = vpack.c.bf16 %v4274_v47, %v4273_v46  ;;  %v4577_v46 = vld [vmem:[%s6159_s7] ss:$0 sm:$0xff] }
0x1b8d   :  { %v3596_v45 = vmul.f32 1.442695, %v3595_v50  ;;  %v4276_v50 = vld [vmem:[#allocation11 + $0x38] sm:$0xff] }
0x1b8e   :  { %v3604_v52 = vpop.permute.xlu0 %3603 }
0x1b8f   :  { %5351 = vpow2.f32 %v3596_v45  ;;  %5005 = vmatpush3.msra.mxu1 %v3604_v52  ;;  %v4277_v45 = vld [vmem:[#allocation11 + $0x40] sm:$0xff]  ;;  %v5242_v52 = vpack.c.bf16 %v4276_v50, %v4275_v37 }
0x1b90   :  { %5016 = vmatprep.subr.mxu1 %v5481_v7 }
0x1b92   :  { %v3756_v60 = vpop.permute.xlu0 %3755 }
0x1b99   :  { %v5352_v35 = vpop.eup %5351 }
0x1b9a   :  { %v3598_v1 = vsel %vm450_vm2, %v5352_v35, 0.0 }
0x1b9b   :  { %3599 = vadd.xlane.f32.xlu1 %v3598_v1 }
0x1bac   :  { %3757 = vrot.lane.b32.xlu1 %v5839_v16, %s5489_s14 }
0x1bcb   :  { %v3509_v53 = vpop.f32.mrb[40].mxu1 }
0x1bcc   :  { %v3513_v54 = vadd.f32 %v3509_v53, %v3272_v31  ;;  %v4998_v55 = vpop.f32.mrb[41].mxu1  ;;  %v4280_v53 = vld [vmem:[#allocation11 + $0x58] sm:$0xff] }
0x1bcd   :  { %v4281_v55 = vld [vmem:[#allocation11 + $0x60] sm:$0xff] }
0x1c28   :  { %v3600_v56 = vpop.xlane.xlu1 %3599 }
0x1c29   :  { %5353 = vrcp.f32 %v3600_v56  ;;  %v4282_v56 = vld [vmem:[#allocation11 + $0x68] sm:$0xff] }
0x1c2c   :  { %v3758_v59 = vpop.permute.xlu1 %3757 }
0x1c33   :  { %v5354_v57 = vpop.eup %5353 }
0x1c34   :  { %v3602_v58 = vmul.f32 %v5354_v57, %v5352_v35  ;;  %v4278_v35 = vld [vmem:[#allocation11 + $0x48] sm:$0xff]  ;;  %v5251_v57 = vpack.c.bf16 %v4282_v56, %v4281_v55 }
0x1c35   :  { %v5245_v1 = vpack.c.bf16 %v4278_v35, %v4277_v45  ;;  %v4578_v45 = vld [vmem:[%s6161_s9] ss:$0 sm:$0xff] }
0x1c36   :  { %5007 = vmatmul.mubr.msk.f32.vlgmr.msra.gmra.mrb[42].mxu1 %vm450_vm2, %v3602_v58  ;;  %v4283_v58 = vld [vmem:[#allocation11 + $0x70] sm:$0xff] }
0x1c37   :  { %5017 = vmatpush3.xpose.msk.msra.mxu1 %vm373_vm1, %v3758_v59  ;;  %5018 = vmatprep.mubr.msk.f32.mxu1 %vm5482_vm0, %v5481_v7  ;;  %v4284_v59 = vld [vmem:[#allocation11 + $0x78] sm:$0xff] }
0x1c38   :  { %5226 = vmatprep.subr.bf16.mxu1 %v5486_v2 }
0x1c3a   :  { %5019 = vmatmul.mubr.msk.f32.vlgmr.msra.gmra.mrb[44].mxu1 %vm373_vm1, %v3756_v60  ;;  %v5254_v60 = vpack.c.bf16 %v4284_v59, %v4283_v58 }
0x1c3b   :  { %5228 = vmatpush3.bf16.msra.mxu1 %v5852_v3  ;;  %5030 = vmatprep.mubr.msk.f32.mxu1 %vm5482_vm0, %v5481_v7 }
0x1c3c   :  { %5038 = vmatprep.subr.mxu1 %v5481_v7 }
0x1d09   :  { %v3675_v61 = vpop.f32.mrb[42].mxu1 }
0x1d0a   :  { %v5008_v9 = vpop.f32.mrb[43].mxu1  ;;  %5014 = vmatmul.mubr.msk.f32.vlgmr.msra.gmra.mrb[44].mxu0 %vm373_vm1, %v3675_v61  ;;  %v4368_v61 = vld [vmem:[%s6160_s8] sm:$0xff] }
0x1d0b   :  { %5023 = vmatprep.mubr.msk.f32.mxu0 %vm5482_vm0, %v5481_v7  ;;  %v4369_v9 = vld [vmem:[%s6160_s8 + $0x8] sm:$0xff] }
0x1d0d   :  { %v3829_v62 = vpop.f32.mrb[44].mxu1 }
0x1d0e   :  { %v5020_v63 = vpop.f32.mrb[45].mxu1  ;;  %v3833_v4 = vsel %vm450_vm2, %v3829_v62, -inf }
0x1d0f   :  { %3834 = vmax.xlane.f32.xlu1 %v3833_v4  ;;  %v5257_v63 = vpack.c.bf16 %v4369_v9, %v4368_v61  ;;  %v4371_v4 = vld [vmem:[%s6160_s8 + $0x18] sm:$0xff] }
0x1d20   :  { %3998 = vrot.lane.b32.xlu1 %v5839_v16, %s5490_s25 }
0x1d24   :  { %3996 = vrot.lane.b32.xlu1 %v5872_v48, %s5490_s25 }
0x1d9c   :  { %v3835_v3 = vpop.xlane.xlu1 %3834 }
0x1d9d   :  { %v3836_v5 = vsub.f32 %v3829_v62, %v3835_v3  ;;  %v4370_v62 = vld [vmem:[%s6160_s8 + $0x10] sm:$0xff] }
0x1d9e   :  { %v5260_v3 = vpack.c.bf16 %v4371_v4, %v4370_v62 }
0x1d9f   :  { %v3837_v6 = vmul.f32 1.442695, %v3836_v5  ;;  %v4372_v5 = vld [vmem:[%s6160_s8 + $0x20] sm:$0xff] }
0x1da0   :  { %v3999_v17 = vpop.permute.xlu1 %3998 }
0x1da1   :  { %5355 = vpow2.f32 %v3837_v6  ;;  %v4373_v6 = vld [vmem:[%s6160_s8 + $0x28] sm:$0xff] }
0x1da4   :  { %v3997_v19 = vpop.permute.xlu1 %3996 }
0x1dab   :  { %v5356_v8 = vpop.eup %5355 }
0x1dac   :  { %v3839_v10 = vsel %vm450_vm2, %v5356_v8, 0.0 }
0x1dad   :  { %3840 = vadd.xlane.f32.xlu0 %v3839_v10  ;;  %v4374_v10 = vld [vmem:[%s6160_s8 + $0x30] sm:$0xff] }
0x1dc3   :  { %3844 = vrot.lane.b32.xlu0 %v5646_v42, %s5489_s14 }
0x1ddd   :  { %v3750_v11 = vpop.f32.mrb[44].mxu0 }
0x1dde   :  { %v3754_v12 = vadd.f32 %v3750_v11, %v3513_v54  ;;  %v5015_v13 = vpop.f32.mrb[45].mxu0  ;;  %v4375_v11 = vld [vmem:[%s6160_s8 + $0x38] sm:$0xff] }
0x1ddf   :  { %v4376_v13 = vld [vmem:[%s6160_s8 + $0x40] sm:$0xff] }
0x1e3a   :  { %v3841_v14 = vpop.xlane.xlu0 %3840 }
0x1e3b   :  { %5357 = vrcp.f32 %v3841_v14  ;;  %v4377_v14 = vld [vmem:[%s6160_s8 + $0x48] sm:$0xff] }
0x1e3e   :  { %v3845_v16 = vpop.permute.xlu0 %3844 }
0x1e3f   :  { %5022 = vmatpush3.msra.mxu0 %v3845_v16  ;;  %v5269_v16 = vpack.c.bf16 %v4377_v14, %v4376_v13 }
0x1e40   :  { %5033 = vmatprep.subr.mxu0 %v5481_v7 }
0x1e45   :  { %v5358_v48 = vpop.eup %5357 }
0x1e46   :  { %v3843_v18 = vmul.f32 %v5358_v48, %v5356_v8  ;;  %v5263_v8 = vpack.c.bf16 %v4373_v6, %v4372_v5 }
0x1e48   :  { %5024 = vmatmul.mubr.msk.f32.vlgmr.msra.gmra.mrb[46].mxu0 %vm450_vm2, %v3843_v18 }
0x1e49   :  { %5034 = vmatpush3.xpose.msk.msra.mxu0 %vm373_vm1, %v3999_v17  ;;  %5035 = vmatprep.mubr.msk.f32.mxu0 %vm5482_vm0, %v5481_v7 }
0x1e4a   :  { %5229 = vmatprep.subr.bf16.mxu0 %v5486_v2 }
0x1e4c   :  { %5036 = vmatmul.mubr.msk.f32.vlgmr.msra.gmra.mrb[48].mxu0 %vm373_vm1, %v3997_v19  ;;  %v4245_v19 = vld [vmem:[#allocation2 + $0x8] sm:$0xff] }
0x1e4d   :  { %5231 = vmatpush3.bf16.msra.mxu0 %v5882_v51  ;;  %5047 = vmatprep.mubr.msk.f32.mxu0 %vm5482_vm0, %v5481_v7 }
0x1e4e   :  { %5256 = vmatprep.subr.bf16.mxu0 %v5486_v2 }
0x1f1b   :  { %v3916_v20 = vpop.f32.mrb[46].mxu0 }
0x1f1c   :  { %v5025_v44 = vpop.f32.mrb[47].mxu0  ;;  %5031 = vmatmul.mubr.msk.f32.vlgmr.msra.gmra.mrb[46].mxu1 %vm373_vm1, %v3916_v20 }
0x1f1d   :  { %5040 = vmatprep.mubr.msk.f32.mxu1 %vm5482_vm0, %v5481_v7 }
0x1f1f   :  { %v4070_v33 = vpop.f32.mrb[48].mxu0 }
0x1f20   :  { %v5037_v22 = vpop.f32.mrb[49].mxu0  ;;  %v4074_v23 = vsel %vm450_vm2, %v4070_v33, -inf }
0x1f21   :  { %4075 = vmax.xlane.f32.xlu0 %v4074_v23 }
0x1f37   :  { %4085 = vrot.lane.b32.xlu0 %v5646_v42, %s5490_s25 }
0x1fae   :  { %v4076_v51 = vpop.xlane.xlu0 %4075 }
0x1faf   :  { %v4077_v24 = vsub.f32 %v4070_v33, %v4076_v51 }
0x1fb1   :  { %v4078_v25 = vmul.f32 1.442695, %v4077_v24 }
0x1fb2   :  { %v4086_v29 = vpop.permute.xlu0 %4085 }
0x1fb3   :  { %5359 = vpow2.f32 %v4078_v25  ;;  %5039 = vmatpush3.msra.mxu1 %v4086_v29 }
0x1fb4   :  { %5232 = vmatprep.subr.bf16.mxu1 %v5486_v2 }
0x1fbd   :  { %v5360_v26 = vpop.eup %5359 }
0x1fbe   :  { %v4080_v38 = vsel %vm450_vm2, %v5360_v26, 0.0 }
0x1fbf   :  { %4081 = vadd.xlane.f32.xlu1 %v4080_v38 }
0x1fef   :  { %v3991_v27 = vpop.f32.mrb[46].mxu1 }
0x1ff0   :  { %v6062_v28 = vadd.f32 %v3991_v27, %v3754_v12  ;;  %v5032_v30 = vpop.f32.mrb[47].mxu1  ;;  %v5266_v12 = vpack.c.bf16 %v4375_v11, %v4374_v10 }
0x204c   :  { %v4082_v0 = vpop.xlane.xlu1 %4081 }
0x204d   :  { %5361 = vrcp.f32 %v4082_v0 }
0x2057   :  { %v5362_v31 = vpop.eup %5361 }
0x2058   :  { %v4084_v42 = vmul.f32 %v5362_v31, %v5360_v26 }
0x205a   :  { %5041 = vmatmul.mubr.msk.f32.vlgmr.msra.gmra.mrb[48].mxu1 %vm450_vm2, %v4084_v42  ;;  %v4378_v42 = vld [vmem:[%s6160_s8 + $0x50] sm:$0xff] }
0x205b   :  { %5082 = vmatprep.mubr.msk.f32.mxu1 %vm5482_vm0, %v5481_v7  ;;  %5234 = vmatpush3.bf16.msra.mxu1 %v5233_v36  ;;  %v5272_v34 = vpack.c.bf16 %v4379_v32, %v4378_v42  ;;  %v4380_v36 = vld [vmem:[%s6160_s8 + $0x60] sm:$0xff] }
0x205c   :  { %5235 = vmatprep.subr.bf16.mxu1 %v5486_v2 }
0x205f   :  { %5237 = vmatpush3.bf16.msra.mxu1 %v5236_v43  ;;  %v5278_v43 = vpack.c.bf16 %v4383_v41, %v4382_v40 }
0x2060   :  { %5238 = vmatprep.subr.bf16.mxu1 %v5486_v2 }
0x2063   :  { %5240 = vmatpush3.bf16.msra.mxu1 %v5239_v49 }
0x2064   :  { %5241 = vmatprep.subr.bf16.mxu1 %v5486_v2 }
0x2067   :  { %5243 = vmatpush3.bf16.msra.mxu1 %v5242_v52 }
0x2068   :  { %5244 = vmatprep.subr.bf16.mxu1 %v5486_v2 }
0x206b   :  { %5246 = vmatpush3.bf16.msra.mxu1 %v5245_v1 }
0x206c   :  { %5247 = vmatprep.subr.bf16.mxu1 %v5486_v2 }
0x212d   :  { %v4157_v15 = vpop.f32.mrb[48].mxu1 }
0x212e   :  { %v5042_v39 = vpop.f32.mrb[49].mxu1  ;;  %5048 = vmatmul.mubr.msk.f32.vlgmr.msra.gmra.mrb[50].mxu0 %vm373_vm1, %v4157_v15  ;;  %v4381_v15 = vld [vmem:[%s6160_s8 + $0x68] sm:$0xff]  ;;  %s5491_s8 = smov [#allocation12]  }
0x212f   :  { %5117 = vmatprep.mubr.msk.f32.mxu0 %vm5482_vm0, %v5481_v7  ;;  %v4279_v7 = vld [vmem:[#allocation11 + $0x50] sm:$0xff]  ;;  %5258 = vmatpush3.bf16.msra.mxu0 %v5257_v63  ;;  %v5275_v39 = vpack.c.bf16 %v4381_v15, %v4380_v36  ;;  %s4469_s17 = sshll.u32 %s5491_s8, 4  ;;  %s4470_s17 = int_to_ptr.vmem [resolvable:$true] %s4469_s17 }
0x2130   :  { %v5248_v54 = vpack.c.bf16 %v4280_v53, %v4279_v7  ;;  %5259 = vmatprep.subr.bf16.mxu0 %v5486_v2  ;;  %s5443_s21 = scalar_lea.vmem %s4470_s17, 32  ;;  %p5448_p2 = scmp.lt.s32.totalorder %s4470_s17, %s4470_s17 }
0x2131   :  { %p5444_p1 = scmp.ne.s32.totalorder %s4470_s17, %s5443_s21  ;;  %p5449_p3 = scmp.lt.s32.totalorder %s5443_s21, %s5443_s21 }
0x2132   :  { %5249 = vmatpush3.bf16.msra.mxu1 %v5248_v54 }
0x2133   :  { %5250 = vmatprep.subr.bf16.mxu1 %v5486_v2  ;;  %5261 = vmatpush3.bf16.msra.mxu0 %v5260_v3  ;;  %p5450_p4 = por %p5449_p3, %p5448_p2 }
0x2134   :  { %5262 = vmatprep.subr.bf16.mxu0 %v5486_v2 }
0x2135   :  { %p5451_p5 = pnand %p5450_p4, %p5444_p1 }
0x2136   :  { %5252 = vmatpush3.bf16.msra.mxu1 %v5251_v57 }
0x2137   :  { %5253 = vmatprep.subr.bf16.mxu1 %v5486_v2  ;;  %5264 = vmatpush3.bf16.msra.mxu0 %v5263_v8 }
0x2138   :  { %5265 = vmatprep.subr.bf16.mxu0 %v5486_v2 }
0x213a   :  { %5255 = vmatpush3.bf16.msra.mxu1 %v5254_v60 }
0x213b   :  { %5267 = vmatpush3.bf16.msra.mxu0 %v5266_v12 }
0x213c   :  { %5268 = vmatprep.subr.bf16.mxu0 %v5486_v2 }
0x213f   :  { %5270 = vmatpush3.bf16.msra.mxu0 %v5269_v16 }
0x2140   :  { %5271 = vmatprep.subr.bf16.mxu0 %v5486_v2 }
0x2143   :  { %5273 = vmatpush3.bf16.msra.mxu0 %v5272_v34 }
0x2144   :  { %5274 = vmatprep.subr.bf16.mxu0 %v5486_v2 }
0x2147   :  { %5276 = vmatpush3.bf16.msra.mxu0 %v5275_v39 }
0x2148   :  { %5277 = vmatprep.subr.bf16.mxu0 %v5486_v2 }
0x214b   :  { %5279 = vmatpush3.bf16.msra.mxu0 %v5278_v43 }
0x2201   :  { %v4232_v48 = vpop.f32.mrb[50].mxu0 }
0x2202   :  { %v4236_v17 = vadd.f32 %v4232_v48, %v6062_v28  ;;  %v5049_v18 = vpop.f32.mrb[51].mxu0 }
0x2204   :  { %v4244_v20 = vadd.f32 %v5921_v21, %v4236_v17 }
0x2206   :  { %v4246_v44 = vmul.f32 %v4245_v19, %v4244_v20 }
0x2208   :  { %4247 = vst [vmem:[#allocation3 + $0x1] ss:$8 sps:$4 sm:$0x11] %v4246_v44   ;;  %4248 = vst [vmem:[#allocation3 + $0x2] ss:$8 sps:$4 sm:$0x22] %v4246_v44  }
0x2209   :  { %4249 = vst [vmem:[#allocation3 + $0x3] ss:$8 sps:$4 sm:$0x44] %v4246_v44   ;;  %4250 = vst [vmem:[#allocation3 + $0x4] ss:$8 sps:$4 sm:$0x88] %v4246_v44  }
0x2210   :  { %v4255_v33 = vld [vmem:[#allocation3] sm:$0xff]  ;;  %v4256_v22 = vld [vmem:[#allocation3 + $0x8] sm:$0xff] }
0x2211   :  { %v4257_v23 = vrot.slane %v4255_v33, 4  ;;  %v4263_v51 = vrot.slane %v4256_v22, 4 }
0x2213   :  { %v4258_v24 = vmax.f32 %v4255_v33, %v4257_v23  ;;  %v4264_v25 = vmax.f32 %v4256_v22, %v4263_v51 }
0x2215   :  { %v4259_v29 = vrot.slane %v4258_v24, 2  ;;  %v4265_v26 = vrot.slane %v4264_v25, 2 }
0x2217   :  { %v4260_v38 = vmax.f32 %v4258_v24, %v4259_v29  ;;  %v4266_v27 = vmax.f32 %v4264_v25, %v4265_v26 }
0x2219   :  { %v4261_v28 = vrot.slane %v4260_v38, 1  ;;  %v4267_v30 = vrot.slane %v4266_v27, 1 }
0x221b   :  { %v4262_v0 = vmax.f32 %v4260_v38, %v4261_v28  ;;  %v4268_v21 = vmax.f32 %v4266_v27, %v4267_v30 }
0x221d   :  { %v4295_v31 = vsel %vm4294_vm3, %v4268_v21, %v4262_v0 }
0x221e   :  { %5083 = vmatmul.mubr.f32.vlgmr.msra.gmra.mrb[50].mxu1 %v4295_v31 }
0x22f1   :  { %v4363_v47 = vpop.f32.mrb[50].mxu1 }
0x22f2   :  { %v4364_v49 = vadd.f32 %v4577_v46, %v4363_v47  ;;  %v5084_v37 = vpop.f32.mrb[51].mxu1 }
0x22f4   :  { %5363 = vtanh.f32 %v4364_v49 }
0x22fe   :  { %v5364_v50 = vpop.eup %5363 }
0x22ff   :  { %5118 = vmatmul.mubr.f32.vlgmr.msra.gmra.mrb[52].mxu0 %v5364_v50 }
0x23d2   :  { %v4457_v52 = vpop.f32.mrb[52].mxu0 }
0x23d3   :  { %v4458_v2 = vadd.f32 %v4578_v45, %v4457_v52  ;;  %v5119_v35 = vpop.f32.mrb[53].mxu0 }
0x23d5   :  { %4462 = vst.msk [vmem:[#allocation12] sm:$0x3] %vm4461_vm4, %v4458_v2 }
0x23d6   :  { %5454 = shalt.err (!%p5451_p5)
}
0x23d7   :  { %s5455_s25 = scalar_lea.hbm %s6162_s10, 32 }
0x23d8   :  { %p5456_p6 = scmp.ne.s32.totalorder %s6162_s10, %s5455_s25  ;;  %p5459_p7 = scmp.lt.u32.totalorder %s5455_s25, %s6162_s10 }
0x23da   :  { %p5461_p8 = pnand %p5459_p7, %p5456_p6 }
0x23dc   :  { %5464 = shalt.err (!%p5461_p8)
}
0x23dd   :  { %4472 = dma.vmem_to_hbm [thread:$0]  %s4470_s17, 32, %s6162_s10, [#allocation6]  }
0x23de   :  { %5471 = dma.done.wait [#allocation6], 32  }
0x23df   :  { %5472 = vsyncadd [#allocation6], 4294967264 }
0x23e0   :  { %4476 = vsyncpa [#allocation5], 1 }
0x23e1   :  { %4477 = vsyncpa [#allocation10], 1 }
0x23e2   :  { %4478 = vsyncpa [#allocation6], 1 }
0x23e3   :  { %4479 = vsyncpa [#allocation7], 1 }

</bundles_post_ra>
